<compile_context>
chip_gen: v5e
topology: v5e:2x2
jax: 0.10.0
libtpu: 0.0.40
codegen_flags: <defaults>
</compile_context>

<pallas_src>
import functools

import jax
import jax.numpy as jnp
from jax.experimental import pallas as pl
from jax.experimental.pallas import tpu as pltpu


def _encoder_block_kernel(
    x_ref,                      # (bn, L, D) tile of batch elements, f32
    wqkv_ref, bqkv_ref,         # (D, 3D) bf16, (1, 3D) f32   (fused Q|K|V)
    woh_ref, bo_ref,            # (nhead, dh, D) bf16, (1, D) f32
    g1_ref, beta1_ref,          # layernorm1 (1, D) f32
    w1_ref, fb1_ref,            # FFN layer 1: (D, 4D) bf16, (1, 4D) f32
    w2_ref, fb2_ref,            # FFN layer 2: (4D, D) bf16, (1, D) f32
    g2_ref, beta2_ref,          # layernorm2 (1, D) f32
    o_ref,                      # (bn, L, D) output
    *, nhead,
):
    f32 = jnp.float32
    bf16 = jnp.bfloat16
    bn, L, D = x_ref.shape
    M = bn * L
    dh = D // nhead
    scale = 1.0 / (dh ** 0.5)
    eps = 1e-5

    # Fold batch*seq into the matmul M dimension.
    x = x_ref[...].astype(f32).reshape(M, D)          # (M, D) f32 residual path
    x_bf = x.astype(bf16)

    # ---- fused QKV projection (one wide MXU pass) ----
    qkv = jnp.dot(x_bf, wqkv_ref[...], preferred_element_type=f32) + bqkv_ref[...]
    q = qkv[:, 0 * D:1 * D] * scale                   # scale q once
    k = qkv[:, 1 * D:2 * D]
    v = qkv[:, 2 * D:3 * D]

    def to_heads(t):
        # (M, D) -> (nhead*bn, L, dh).  Per-head lane slices are stacked along
        # a NEW leading (major) axis, then only leading-dim reshapes follow:
        # no in-kernel transposes, no scratch stores.
        th = jnp.stack([t[:, h * dh:(h + 1) * dh] for h in range(nhead)], axis=0)
        return th.reshape(nhead, bn, L, dh).reshape(nhead * bn, L, dh)

    qh = to_heads(q).astype(bf16)
    kh = to_heads(k).astype(bf16)
    vh = to_heads(v).astype(bf16)

    # ---- multi-head attention: single batched einsum pair, stats in f32 ----
    s = jnp.einsum("bqd,bkd->bqk", qh, kh, preferred_element_type=f32)
    s = s - s.max(axis=-1, keepdims=True)
    p = jnp.exp(s)
    p = p * pl.reciprocal(p.sum(axis=-1, keepdims=True), approx=True)
    o = jnp.einsum("bqk,bkd->bqd", p.astype(bf16), vh, preferred_element_type=f32)

    # ---- output projection fused with the head re-merge: batched matmul over
    # per-head W_o slabs + leading-axis sum (no lane concatenate, no scratch).
    o = o.reshape(nhead, bn, L, dh).reshape(nhead, M, dh).astype(bf16)
    attn_out = jnp.einsum("hmd,hdn->hmn", o, woh_ref[...],
                          preferred_element_type=f32).sum(axis=0) + bo_ref[...]

    # ---- residual + LayerNorm1 (dropout == identity), stats in f32 ----
    h1 = x + attn_out
    mu = h1.mean(axis=-1, keepdims=True)
    var = ((h1 - mu) ** 2).mean(axis=-1, keepdims=True)
    h1 = (h1 - mu) * jax.lax.rsqrt(var + eps) * g1_ref[...] + beta1_ref[...]

    # ---- feed-forward: Linear(D, 4D) -> ReLU -> Linear(4D, D), bf16 operands ----
    ff = jnp.dot(h1.astype(bf16), w1_ref[...], preferred_element_type=f32) + fb1_ref[...]
    ff = jnp.maximum(ff, 0.0)
    ff = jnp.dot(ff.astype(bf16), w2_ref[...], preferred_element_type=f32) + fb2_ref[...]

    # ---- residual + LayerNorm2 (dropout == identity) ----
    y = h1 + ff
    mu2 = y.mean(axis=-1, keepdims=True)
    var2 = ((y - mu2) ** 2).mean(axis=-1, keepdims=True)
    y = (y - mu2) * jax.lax.rsqrt(var2 + eps) * g2_ref[...] + beta2_ref[...]

    o_ref[...] = y.reshape(bn, L, D).astype(o_ref.dtype)


def make_params(key, d_model):
    """Deterministic synthetic parameters (weights stored pre-transposed so the
    kernel computes x @ W), all f32."""
    ks = jax.random.split(key, 12)
    std = 0.02
    D, F = d_model, 4 * d_model
    return {
        "wq": std * jax.random.normal(ks[0], (D, D), jnp.float32),
        "wk": std * jax.random.normal(ks[1], (D, D), jnp.float32),
        "wv": std * jax.random.normal(ks[2], (D, D), jnp.float32),
        "bq": std * jax.random.normal(ks[3], (1, D), jnp.float32),
        "bk": std * jax.random.normal(ks[4], (1, D), jnp.float32),
        "bv": std * jax.random.normal(ks[5], (1, D), jnp.float32),
        "wo": std * jax.random.normal(ks[6], (D, D), jnp.float32),
        "bo": std * jax.random.normal(ks[7], (1, D), jnp.float32),
        "g1": jnp.ones((1, D), jnp.float32),
        "beta1": jnp.zeros((1, D), jnp.float32),
        "w1": std * jax.random.normal(ks[8], (D, F), jnp.float32),
        "bb1": std * jax.random.normal(ks[9], (1, F), jnp.float32),
        "w2": std * jax.random.normal(ks[10], (F, D), jnp.float32),
        "bb2": std * jax.random.normal(ks[11], (1, D), jnp.float32),
        "g2": jnp.ones((1, D), jnp.float32),
        "beta2": jnp.zeros((1, D), jnp.float32),
    }


def prepare_params(params, nhead):
    """One-time fusion / casting of weights (done OUTSIDE the per-call path):
    fused bf16 QKV weight, per-head W_o slabs, bf16 FFN weights."""
    D = params["wq"].shape[0]
    dh = D // nhead
    bf16 = jnp.bfloat16
    wqkv = jnp.concatenate([params["wq"], params["wk"], params["wv"]], axis=1).astype(bf16)
    bqkv = jnp.concatenate([params["bq"], params["bk"], params["bv"]], axis=1).astype(jnp.float32)
    woh = params["wo"].reshape(nhead, dh, D).astype(bf16)   # rows of wo are head-major
    return {
        "wqkv": wqkv, "bqkv": bqkv,
        "woh": woh, "bo": params["bo"],
        "g1": params["g1"], "beta1": params["beta1"],
        "w1": params["w1"].astype(bf16), "fb1": params["bb1"],
        "w2": params["w2"].astype(bf16), "fb2": params["bb2"],
        "g2": params["g2"], "beta2": params["beta2"],
    }


def _activation_tile_bytes(bn, L, D, nhead):
    """Rough per-grid-step VMEM estimate for the activation values."""
    M = bn * L
    b = 0
    b += 2 * M * D * 4                  # residual x + h1 (f32)
    b += M * 3 * D * 4                  # fused qkv (f32)
    b += 3 * M * D * 2                  # bf16 q/k/v head views
    b += bn * nhead * L * L * (4 + 2)   # scores f32 + probs bf16
    b += nhead * M * D * 4              # per-head out-proj partials (f32)
    b += M * 4 * D * (4 + 2)            # FFN intermediate f32 + bf16 copy
    b += 2 * 2 * bn * L * D * 4         # double-buffered in/out tiles
    return b


def _pick_block_batch(N, L, D, nhead, vmem_limit, weight_bytes):
    # Larger tiles amortize the ~0.35us/step grid overhead; cap rows per tile
    # by generation (smaller VMEM -> smaller tiles) and keep >= 2 grid steps
    # so both v7x TensorCores get work on the "parallel" axis.
    row_target = 512 if vmem_limit >= 96 * (1 << 20) else 256
    budget = max(vmem_limit - weight_bytes, 1 << 20)
    max_bn = max(1, min(N, row_target // max(L, 1)))
    if N >= 2:
        max_bn = min(max_bn, max(1, N // 2))
    for cand in range(max_bn, 0, -1):
        if N % cand == 0 and _activation_tile_bytes(cand, L, D, nhead) <= budget:
            return cand
    return 1


def self_attn_forward(x_lne, prepared, nhead, *, block_batch=None):
    """x_lne: (L, N, E) float32, matching PyTorch MultiheadAttention layout."""
    L, N, E = x_lne.shape
    assert E % nhead == 0, "d_model must be divisible by nhead"

    # Batch-major layout so attention's per-sequence batching needs no
    # in-kernel transposes (the only wrapper-side activation transposes left).
    x = jnp.transpose(x_lne, (1, 0, 2))  # (N, L, E)

    try:
        vmem_cap = int(pltpu.get_tpu_info().vmem_capacity_bytes)
    except Exception:
        vmem_cap = 64 * 1024 * 1024      # conservative fallback (v7x-sized)
    vmem_limit = int(0.75 * vmem_cap)    # 96 MiB on v5e/v6e, 48 MiB on v7x

    names = ("wqkv", "bqkv", "woh", "bo", "g1", "beta1",
             "w1", "fb1", "w2", "fb2", "g2", "beta2")
    plist = [prepared[n] for n in names]
    weight_bytes = sum(int(p.size) * p.dtype.itemsize for p in plist)

    bn = block_batch if block_batch is not None else _pick_block_batch(
        N, L, E, nhead, vmem_limit, weight_bytes)
    assert N % bn == 0

    kernel = functools.partial(_encoder_block_kernel, nhead=nhead)
    out_shape = jax.ShapeDtypeStruct((N, L, E), x_lne.dtype)

    def build(weight_pipeline_mode):
        def rep_spec(arr):
            nd = arr.ndim
            if weight_pipeline_mode is None:
                return pl.BlockSpec(arr.shape, lambda b, _nd=nd: (0,) * _nd)
            return pl.BlockSpec(arr.shape, lambda b, _nd=nd: (0,) * _nd,
                                pipeline_mode=weight_pipeline_mode)

        return pl.pallas_call(
            kernel,
            out_shape=out_shape,
            grid=(N // bn,),
            in_specs=[pl.BlockSpec((bn, L, E), lambda b: (b, 0, 0))]
            + [rep_spec(p) for p in plist],
            out_specs=pl.BlockSpec((bn, L, E), lambda b: (b, 0, 0)),
            compiler_params=pltpu.CompilerParams(
                dimension_semantics=("parallel",),
                vmem_limit_bytes=vmem_limit,
            ),
        )

    try:
        # Constant-index weight blocks never change -> single-buffer them
        # (halves weight VMEM; important for large D on v7x's 64 MiB VMEM).
        out = build(pl.Buffered(1))(x, *plist)
    except Exception:
        # Fallback for jax versions where pipeline_mode / Buffered(1) on a
        # pallas_call BlockSpec is unsupported: default double-buffering.
        out = build(None)(x, *plist)

    return jnp.transpose(out, (1, 0, 2))  # back to (L, N, E)


if __name__ == "__main__":
    d_model = 32
    nhead = 4
    seq = 8
    batch = 2

    key = jax.random.PRNGKey(0)
    k_x, k_p = jax.random.split(key)
    x = jax.random.normal(k_x, (seq, batch, d_model), jnp.float32)  # (L, N, E)
    params = make_params(k_p, d_model)
    prepared = prepare_params(params, nhead)   # one-time weight fusion / casts

    y = self_attn_forward(x, prepared, nhead)
    jax.block_until_ready(y)

    assert y.shape == (seq, batch, d_model)
    assert bool(jnp.all(jnp.isfinite(y)))
    print("KERNEL_OK")
</pallas_src>

<mosaic_0001>
module attributes {stable_mosaic.version = 11 : i64} {
  func.func @_encoder_block_kernel(%arg0: i32, %arg1: memref<1x8x32xf32, #tpu.memory_space<vmem>>, %arg2: memref<32x96xbf16, #tpu.memory_space<vmem>>, %arg3: memref<1x96xf32, #tpu.memory_space<vmem>>, %arg4: memref<4x8x32xbf16, #tpu.memory_space<vmem>>, %arg5: memref<1x32xf32, #tpu.memory_space<vmem>>, %arg6: memref<1x32xf32, #tpu.memory_space<vmem>>, %arg7: memref<1x32xf32, #tpu.memory_space<vmem>>, %arg8: memref<32x128xbf16, #tpu.memory_space<vmem>>, %arg9: memref<1x128xf32, #tpu.memory_space<vmem>>, %arg10: memref<128x32xbf16, #tpu.memory_space<vmem>>, %arg11: memref<1x32xf32, #tpu.memory_space<vmem>>, %arg12: memref<1x32xf32, #tpu.memory_space<vmem>>, %arg13: memref<1x32xf32, #tpu.memory_space<vmem>>, %arg14: memref<1x8x32xf32, #tpu.memory_space<vmem>>) attributes {dimension_semantics = [#tpu.dimension_semantics<parallel>], iteration_bounds = array<i64: 2>, scalar_prefetch = 0 : i64, scratch_operands = 0 : i64, tpu.core_type = #tpu.core_type<tc>, window_params = [{transform_indices = @transform_0, window_bounds = array<i64: 1, 8, 32>}, {pipeline_mode = #tpu.pipeline_mode<synchronous>, transform_indices = @transform_1, window_bounds = array<i64: 32, 96>}, {pipeline_mode = #tpu.pipeline_mode<synchronous>, transform_indices = @transform_2, window_bounds = array<i64: 1, 96>}, {pipeline_mode = #tpu.pipeline_mode<synchronous>, transform_indices = @transform_3, window_bounds = array<i64: 4, 8, 32>}, {pipeline_mode = #tpu.pipeline_mode<synchronous>, transform_indices = @transform_4, window_bounds = array<i64: 1, 32>}, {pipeline_mode = #tpu.pipeline_mode<synchronous>, transform_indices = @transform_5, window_bounds = array<i64: 1, 32>}, {pipeline_mode = #tpu.pipeline_mode<synchronous>, transform_indices = @transform_6, window_bounds = array<i64: 1, 32>}, {pipeline_mode = #tpu.pipeline_mode<synchronous>, transform_indices = @transform_7, window_bounds = array<i64: 32, 128>}, {pipeline_mode = #tpu.pipeline_mode<synchronous>, transform_indices = @transform_8, window_bounds = array<i64: 1, 128>}, {pipeline_mode = #tpu.pipeline_mode<synchronous>, transform_indices = @transform_9, window_bounds = array<i64: 128, 32>}, {pipeline_mode = #tpu.pipeline_mode<synchronous>, transform_indices = @transform_10, window_bounds = array<i64: 1, 32>}, {pipeline_mode = #tpu.pipeline_mode<synchronous>, transform_indices = @transform_11, window_bounds = array<i64: 1, 32>}, {pipeline_mode = #tpu.pipeline_mode<synchronous>, transform_indices = @transform_12, window_bounds = array<i64: 1, 32>}, {transform_indices = @transform_13, window_bounds = array<i64: 1, 8, 32>}]} {
    %c0 = arith.constant 0 : index
    %c0_0 = arith.constant 0 : index
    %c0_1 = arith.constant 0 : index
    %0 = vector.load %arg1[%c0, %c0_0, %c0_1] : memref<1x8x32xf32, #tpu.memory_space<vmem>>, vector<1x8x32xf32>
    %1 = vector.shape_cast %0 : vector<1x8x32xf32> to vector<8x32xf32>
    %2 = arith.truncf %1 : vector<8x32xf32> to vector<8x32xbf16>
    %c0_2 = arith.constant 0 : index
    %c0_3 = arith.constant 0 : index
    %3 = vector.load %arg2[%c0_2, %c0_3] : memref<32x96xbf16, #tpu.memory_space<vmem>>, vector<32x96xbf16>
    %cst = arith.constant dense<0.000000e+00> : vector<8x96xf32>
    %4 = tpu.matmul %2, %3, %cst {dimension_numbers = #tpu.dot_dimension_numbers<[1], [0], [0], [1], [0, 0, 1, 1], [], []>} : vector<8x32xbf16>, vector<32x96xbf16>, vector<8x96xf32> -> vector<8x96xf32>
    %c0_4 = arith.constant 0 : index
    %c0_5 = arith.constant 0 : index
    %5 = vector.load %arg3[%c0_4, %c0_5] : memref<1x96xf32, #tpu.memory_space<vmem>>, vector<1x96xf32>
    %6 = vector.broadcast %5 : vector<1x96xf32> to vector<8x96xf32>
    %7 = arith.addf %4, %6 : vector<8x96xf32>
    %8 = vector.extract_strided_slice %7 {offsets = [0, 0], sizes = [8, 32], strides = [1, 1]} : vector<8x96xf32> to vector<8x32xf32>
    %cst_6 = arith.constant 0.353553385 : f32
    %9 = vector.broadcast %cst_6 : f32 to vector<8x32xf32>
    %10 = arith.mulf %8, %9 : vector<8x32xf32>
    %11 = vector.extract_strided_slice %7 {offsets = [0, 32], sizes = [8, 32], strides = [1, 1]} : vector<8x96xf32> to vector<8x32xf32>
    %12 = vector.extract_strided_slice %7 {offsets = [0, 64], sizes = [8, 32], strides = [1, 1]} : vector<8x96xf32> to vector<8x32xf32>
    %13 = vector.extract_strided_slice %10 {offsets = [0, 0], sizes = [8, 8], strides = [1, 1]} : vector<8x32xf32> to vector<8x8xf32>
    %14 = vector.extract_strided_slice %10 {offsets = [0, 8], sizes = [8, 8], strides = [1, 1]} : vector<8x32xf32> to vector<8x8xf32>
    %15 = vector.extract_strided_slice %10 {offsets = [0, 16], sizes = [8, 8], strides = [1, 1]} : vector<8x32xf32> to vector<8x8xf32>
    %16 = vector.extract_strided_slice %10 {offsets = [0, 24], sizes = [8, 8], strides = [1, 1]} : vector<8x32xf32> to vector<8x8xf32>
    %17 = vector.shape_cast %13 : vector<8x8xf32> to vector<1x8x8xf32>
    %18 = vector.shape_cast %14 : vector<8x8xf32> to vector<1x8x8xf32>
    %19 = vector.shape_cast %15 : vector<8x8xf32> to vector<1x8x8xf32>
    %20 = vector.shape_cast %16 : vector<8x8xf32> to vector<1x8x8xf32>
    %21 = tpu.concatenate %17, %18, %19, %20 in 0 : vector<1x8x8xf32>, vector<1x8x8xf32>, vector<1x8x8xf32>, vector<1x8x8xf32> -> vector<4x8x8xf32>
    %22 = vector.shape_cast %21 : vector<4x8x8xf32> to vector<4x1x8x8xf32>
    %23 = vector.shape_cast %22 : vector<4x1x8x8xf32> to vector<4x8x8xf32>
    %24 = arith.truncf %23 : vector<4x8x8xf32> to vector<4x8x8xbf16>
    %25 = vector.extract_strided_slice %11 {offsets = [0, 0], sizes = [8, 8], strides = [1, 1]} : vector<8x32xf32> to vector<8x8xf32>
    %26 = vector.extract_strided_slice %11 {offsets = [0, 8], sizes = [8, 8], strides = [1, 1]} : vector<8x32xf32> to vector<8x8xf32>
    %27 = vector.extract_strided_slice %11 {offsets = [0, 16], sizes = [8, 8], strides = [1, 1]} : vector<8x32xf32> to vector<8x8xf32>
    %28 = vector.extract_strided_slice %11 {offsets = [0, 24], sizes = [8, 8], strides = [1, 1]} : vector<8x32xf32> to vector<8x8xf32>
    %29 = vector.shape_cast %25 : vector<8x8xf32> to vector<1x8x8xf32>
    %30 = vector.shape_cast %26 : vector<8x8xf32> to vector<1x8x8xf32>
    %31 = vector.shape_cast %27 : vector<8x8xf32> to vector<1x8x8xf32>
    %32 = vector.shape_cast %28 : vector<8x8xf32> to vector<1x8x8xf32>
    %33 = tpu.concatenate %29, %30, %31, %32 in 0 : vector<1x8x8xf32>, vector<1x8x8xf32>, vector<1x8x8xf32>, vector<1x8x8xf32> -> vector<4x8x8xf32>
    %34 = vector.shape_cast %33 : vector<4x8x8xf32> to vector<4x1x8x8xf32>
    %35 = vector.shape_cast %34 : vector<4x1x8x8xf32> to vector<4x8x8xf32>
    %36 = arith.truncf %35 : vector<4x8x8xf32> to vector<4x8x8xbf16>
    %37 = vector.extract_strided_slice %12 {offsets = [0, 0], sizes = [8, 8], strides = [1, 1]} : vector<8x32xf32> to vector<8x8xf32>
    %38 = vector.extract_strided_slice %12 {offsets = [0, 8], sizes = [8, 8], strides = [1, 1]} : vector<8x32xf32> to vector<8x8xf32>
    %39 = vector.extract_strided_slice %12 {offsets = [0, 16], sizes = [8, 8], strides = [1, 1]} : vector<8x32xf32> to vector<8x8xf32>
    %40 = vector.extract_strided_slice %12 {offsets = [0, 24], sizes = [8, 8], strides = [1, 1]} : vector<8x32xf32> to vector<8x8xf32>
    %41 = vector.shape_cast %37 : vector<8x8xf32> to vector<1x8x8xf32>
    %42 = vector.shape_cast %38 : vector<8x8xf32> to vector<1x8x8xf32>
    %43 = vector.shape_cast %39 : vector<8x8xf32> to vector<1x8x8xf32>
    %44 = vector.shape_cast %40 : vector<8x8xf32> to vector<1x8x8xf32>
    %45 = tpu.concatenate %41, %42, %43, %44 in 0 : vector<1x8x8xf32>, vector<1x8x8xf32>, vector<1x8x8xf32>, vector<1x8x8xf32> -> vector<4x8x8xf32>
    %46 = vector.shape_cast %45 : vector<4x8x8xf32> to vector<4x1x8x8xf32>
    %47 = vector.shape_cast %46 : vector<4x1x8x8xf32> to vector<4x8x8xf32>
    %48 = arith.truncf %47 : vector<4x8x8xf32> to vector<4x8x8xbf16>
    "tpu.trace_start"() <{level = 10 : i32, message = "bqd,bkd->bqk"}> : () -> ()
    %cst_7 = arith.constant dense<0.000000e+00> : vector<4x8x8xf32>
    %49 = tpu.matmul %24, %36, %cst_7 {dimension_numbers = #tpu.dot_dimension_numbers<[2], [2], [1], [1], [0, 0, 0, 1, 1, 1], [0], [0]>} : vector<4x8x8xbf16>, vector<4x8x8xbf16>, vector<4x8x8xf32> -> vector<4x8x8xf32>
    "tpu.trace_stop"() : () -> ()
    %cst_8 = arith.constant dense<0xFF800000> : vector<4x8xf32>
    %50 = vector.multi_reduction <maximumf>, %49, %cst_8 [2] : vector<4x8x8xf32> to vector<4x8xf32>
    %51 = vector.shape_cast %50 : vector<4x8xf32> to vector<4x8x1xf32>
    %52 = vector.broadcast %51 : vector<4x8x1xf32> to vector<4x8x8xf32>
    %53 = arith.subf %49, %52 : vector<4x8x8xf32>
    %54 = math.exp %53 : vector<4x8x8xf32>
    %cst_9 = arith.constant dense<0.000000e+00> : vector<4x8xf32>
    %55 = vector.multi_reduction <add>, %54, %cst_9 [2] : vector<4x8x8xf32> to vector<4x8xf32>
    %56 = vector.shape_cast %55 : vector<4x8xf32> to vector<4x8x1xf32>
    %57 = tpu.reciprocal %56 {approx = true} : vector<4x8x1xf32> -> vector<4x8x1xf32>
    %58 = vector.broadcast %57 : vector<4x8x1xf32> to vector<4x8x8xf32>
    %59 = arith.mulf %54, %58 : vector<4x8x8xf32>
    %60 = arith.truncf %59 : vector<4x8x8xf32> to vector<4x8x8xbf16>
    "tpu.trace_start"() <{level = 10 : i32, message = "bqk,bkd->bqd"}> : () -> ()
    %cst_10 = arith.constant dense<0.000000e+00> : vector<4x8x8xf32>
    %61 = tpu.matmul %60, %48, %cst_10 {dimension_numbers = #tpu.dot_dimension_numbers<[2], [1], [1], [2], [0, 0, 0, 1, 1, 2], [0], [0]>} : vector<4x8x8xbf16>, vector<4x8x8xbf16>, vector<4x8x8xf32> -> vector<4x8x8xf32>
    "tpu.trace_stop"() : () -> ()
    %62 = vector.shape_cast %61 : vector<4x8x8xf32> to vector<4x1x8x8xf32>
    %63 = vector.shape_cast %62 : vector<4x1x8x8xf32> to vector<4x8x8xf32>
    %64 = arith.truncf %63 : vector<4x8x8xf32> to vector<4x8x8xbf16>
    %c0_11 = arith.constant 0 : index
    %c0_12 = arith.constant 0 : index
    %c0_13 = arith.constant 0 : index
    %65 = vector.load %arg4[%c0_11, %c0_12, %c0_13] : memref<4x8x32xbf16, #tpu.memory_space<vmem>>, vector<4x8x32xbf16>
    "tpu.trace_start"() <{level = 10 : i32, message = "hmd,hdn->hmn"}> : () -> ()
    %cst_14 = arith.constant dense<0.000000e+00> : vector<4x8x32xf32>
    %66 = tpu.matmul %64, %65, %cst_14 {dimension_numbers = #tpu.dot_dimension_numbers<[2], [1], [1], [2], [0, 0, 0, 1, 1, 2], [0], [0]>} : vector<4x8x8xbf16>, vector<4x8x32xbf16>, vector<4x8x32xf32> -> vector<4x8x32xf32>
    "tpu.trace_stop"() : () -> ()
    %cst_15 = arith.constant dense<0.000000e+00> : vector<8x32xf32>
    %67 = vector.multi_reduction <add>, %66, %cst_15 [0] : vector<4x8x32xf32> to vector<8x32xf32>
    %c0_16 = arith.constant 0 : index
    %c0_17 = arith.constant 0 : index
    %68 = vector.load %arg5[%c0_16, %c0_17] : memref<1x32xf32, #tpu.memory_space<vmem>>, vector<1x32xf32>
    %69 = vector.broadcast %68 : vector<1x32xf32> to vector<8x32xf32>
    %70 = arith.addf %67, %69 : vector<8x32xf32>
    %71 = arith.addf %1, %70 : vector<8x32xf32>
    %cst_18 = arith.constant dense<0.000000e+00> : vector<8xf32>
    %72 = vector.multi_reduction <add>, %71, %cst_18 [1] : vector<8x32xf32> to vector<8xf32>
    %73 = vector.shape_cast %72 : vector<8xf32> to vector<8x1xf32>
    %cst_19 = arith.constant 3.200000e+01 : f32
    %74 = vector.broadcast %cst_19 : f32 to vector<8x1xf32>
    %75 = arith.divf %73, %74 : vector<8x1xf32>
    %76 = vector.broadcast %75 : vector<8x1xf32> to vector<8x32xf32>
    %77 = arith.subf %71, %76 : vector<8x32xf32>
    %78 = arith.mulf %77, %77 : vector<8x32xf32>
    %cst_20 = arith.constant dense<0.000000e+00> : vector<8xf32>
    %79 = vector.multi_reduction <add>, %78, %cst_20 [1] : vector<8x32xf32> to vector<8xf32>
    %80 = vector.shape_cast %79 : vector<8xf32> to vector<8x1xf32>
    %cst_21 = arith.constant 3.200000e+01 : f32
    %81 = vector.broadcast %cst_21 : f32 to vector<8x1xf32>
    %82 = arith.divf %80, %81 : vector<8x1xf32>
    %83 = vector.broadcast %75 : vector<8x1xf32> to vector<8x32xf32>
    %84 = arith.subf %71, %83 : vector<8x32xf32>
    %cst_22 = arith.constant 9.99999974E-6 : f32
    %85 = vector.broadcast %cst_22 : f32 to vector<8x1xf32>
    %86 = arith.addf %82, %85 : vector<8x1xf32>
    %87 = math.rsqrt %86 : vector<8x1xf32>
    %88 = vector.broadcast %87 : vector<8x1xf32> to vector<8x32xf32>
    %89 = arith.mulf %84, %88 : vector<8x32xf32>
    %c0_23 = arith.constant 0 : index
    %c0_24 = arith.constant 0 : index
    %90 = vector.load %arg6[%c0_23, %c0_24] : memref<1x32xf32, #tpu.memory_space<vmem>>, vector<1x32xf32>
    %91 = vector.broadcast %90 : vector<1x32xf32> to vector<8x32xf32>
    %92 = arith.mulf %89, %91 : vector<8x32xf32>
    %c0_25 = arith.constant 0 : index
    %c0_26 = arith.constant 0 : index
    %93 = vector.load %arg7[%c0_25, %c0_26] : memref<1x32xf32, #tpu.memory_space<vmem>>, vector<1x32xf32>
    %94 = vector.broadcast %93 : vector<1x32xf32> to vector<8x32xf32>
    %95 = arith.addf %92, %94 : vector<8x32xf32>
    %96 = arith.truncf %95 : vector<8x32xf32> to vector<8x32xbf16>
    %c0_27 = arith.constant 0 : index
    %c0_28 = arith.constant 0 : index
    %97 = vector.load %arg8[%c0_27, %c0_28] : memref<32x128xbf16, #tpu.memory_space<vmem>>, vector<32x128xbf16>
    %cst_29 = arith.constant dense<0.000000e+00> : vector<8x128xf32>
    %98 = tpu.matmul %96, %97, %cst_29 {dimension_numbers = #tpu.dot_dimension_numbers<[1], [0], [0], [1], [0, 0, 1, 1], [], []>} : vector<8x32xbf16>, vector<32x128xbf16>, vector<8x128xf32> -> vector<8x128xf32>
    %c0_30 = arith.constant 0 : index
    %c0_31 = arith.constant 0 : index
    %99 = vector.load %arg9[%c0_30, %c0_31] : memref<1x128xf32, #tpu.memory_space<vmem>>, vector<1x128xf32>
    %100 = vector.broadcast %99 : vector<1x128xf32> to vector<8x128xf32>
    %101 = arith.addf %98, %100 : vector<8x128xf32>
    %cst_32 = arith.constant 0.000000e+00 : f32
    %102 = vector.broadcast %cst_32 : f32 to vector<8x128xf32>
    %103 = arith.maximumf %101, %102 : vector<8x128xf32>
    %104 = arith.truncf %103 : vector<8x128xf32> to vector<8x128xbf16>
    %c0_33 = arith.constant 0 : index
    %c0_34 = arith.constant 0 : index
    %105 = vector.load %arg10[%c0_33, %c0_34] : memref<128x32xbf16, #tpu.memory_space<vmem>>, vector<128x32xbf16>
    %cst_35 = arith.constant dense<0.000000e+00> : vector<8x32xf32>
    %106 = tpu.matmul %104, %105, %cst_35 {dimension_numbers = #tpu.dot_dimension_numbers<[1], [0], [0], [1], [0, 0, 1, 1], [], []>} : vector<8x128xbf16>, vector<128x32xbf16>, vector<8x32xf32> -> vector<8x32xf32>
    %c0_36 = arith.constant 0 : index
    %c0_37 = arith.constant 0 : index
    %107 = vector.load %arg11[%c0_36, %c0_37] : memref<1x32xf32, #tpu.memory_space<vmem>>, vector<1x32xf32>
    %108 = vector.broadcast %107 : vector<1x32xf32> to vector<8x32xf32>
    %109 = arith.addf %106, %108 : vector<8x32xf32>
    %110 = arith.addf %95, %109 : vector<8x32xf32>
    %cst_38 = arith.constant dense<0.000000e+00> : vector<8xf32>
    %111 = vector.multi_reduction <add>, %110, %cst_38 [1] : vector<8x32xf32> to vector<8xf32>
    %112 = vector.shape_cast %111 : vector<8xf32> to vector<8x1xf32>
    %cst_39 = arith.constant 3.200000e+01 : f32
    %113 = vector.broadcast %cst_39 : f32 to vector<8x1xf32>
    %114 = arith.divf %112, %113 : vector<8x1xf32>
    %115 = vector.broadcast %114 : vector<8x1xf32> to vector<8x32xf32>
    %116 = arith.subf %110, %115 : vector<8x32xf32>
    %117 = arith.mulf %116, %116 : vector<8x32xf32>
    %cst_40 = arith.constant dense<0.000000e+00> : vector<8xf32>
    %118 = vector.multi_reduction <add>, %117, %cst_40 [1] : vector<8x32xf32> to vector<8xf32>
    %119 = vector.shape_cast %118 : vector<8xf32> to vector<8x1xf32>
    %cst_41 = arith.constant 3.200000e+01 : f32
    %120 = vector.broadcast %cst_41 : f32 to vector<8x1xf32>
    %121 = arith.divf %119, %120 : vector<8x1xf32>
    %122 = vector.broadcast %114 : vector<8x1xf32> to vector<8x32xf32>
    %123 = arith.subf %110, %122 : vector<8x32xf32>
    %cst_42 = arith.constant 9.99999974E-6 : f32
    %124 = vector.broadcast %cst_42 : f32 to vector<8x1xf32>
    %125 = arith.addf %121, %124 : vector<8x1xf32>
    %126 = math.rsqrt %125 : vector<8x1xf32>
    %127 = vector.broadcast %126 : vector<8x1xf32> to vector<8x32xf32>
    %128 = arith.mulf %123, %127 : vector<8x32xf32>
    %c0_43 = arith.constant 0 : index
    %c0_44 = arith.constant 0 : index
    %129 = vector.load %arg12[%c0_43, %c0_44] : memref<1x32xf32, #tpu.memory_space<vmem>>, vector<1x32xf32>
    %130 = vector.broadcast %129 : vector<1x32xf32> to vector<8x32xf32>
    %131 = arith.mulf %128, %130 : vector<8x32xf32>
    %c0_45 = arith.constant 0 : index
    %c0_46 = arith.constant 0 : index
    %132 = vector.load %arg13[%c0_45, %c0_46] : memref<1x32xf32, #tpu.memory_space<vmem>>, vector<1x32xf32>
    %133 = vector.broadcast %132 : vector<1x32xf32> to vector<8x32xf32>
    %134 = arith.addf %131, %133 : vector<8x32xf32>
    %135 = vector.shape_cast %134 : vector<8x32xf32> to vector<1x8x32xf32>
    %c0_47 = arith.constant 0 : index
    %c0_48 = arith.constant 0 : index
    %c0_49 = arith.constant 0 : index
    %136 = vector.load %arg14[%c0_47, %c0_48, %c0_49] : memref<1x8x32xf32, #tpu.memory_space<vmem>>, vector<1x8x32xf32>
    tpu.vector_store %arg14[%c0_47, %c0_48, %c0_49], %135 {strides = array<i32>} : memref<1x8x32xf32, #tpu.memory_space<vmem>>, vector<1x8x32xf32>,
    return
  }
  func.func @transform_0(%arg0: i32) -> (i32, i32, i32) {
    %c0_i32 = arith.constant 0 : i32
    %c0_i32_0 = arith.constant 0 : i32
    %c0_i32_1 = arith.constant 0 : i32
    return %arg0, %c0_i32, %c0_i32_0 : i32, i32, i32
  }
  func.func @transform_1(%arg0: i32) -> (i32, i32) {
    %c0_i32 = arith.constant 0 : i32
    %c0_i32_0 = arith.constant 0 : i32
    %c0_i32_1 = arith.constant 0 : i32
    return %c0_i32, %c0_i32_0 : i32, i32
  }
  func.func @transform_2(%arg0: i32) -> (i32, i32) {
    %c0_i32 = arith.constant 0 : i32
    %c0_i32_0 = arith.constant 0 : i32
    %c0_i32_1 = arith.constant 0 : i32
    return %c0_i32, %c0_i32_0 : i32, i32
  }
  func.func @transform_3(%arg0: i32) -> (i32, i32, i32) {
    %c0_i32 = arith.constant 0 : i32
    %c0_i32_0 = arith.constant 0 : i32
    %c0_i32_1 = arith.constant 0 : i32
    %c0_i32_2 = arith.constant 0 : i32
    return %c0_i32, %c0_i32_0, %c0_i32_1 : i32, i32, i32
  }
  func.func @transform_4(%arg0: i32) -> (i32, i32) {
    %c0_i32 = arith.constant 0 : i32
    %c0_i32_0 = arith.constant 0 : i32
    %c0_i32_1 = arith.constant 0 : i32
    return %c0_i32, %c0_i32_0 : i32, i32
  }
  func.func @transform_5(%arg0: i32) -> (i32, i32) {
    %c0_i32 = arith.constant 0 : i32
    %c0_i32_0 = arith.constant 0 : i32
    %c0_i32_1 = arith.constant 0 : i32
    return %c0_i32, %c0_i32_0 : i32, i32
  }
  func.func @transform_6(%arg0: i32) -> (i32, i32) {
    %c0_i32 = arith.constant 0 : i32
    %c0_i32_0 = arith.constant 0 : i32
    %c0_i32_1 = arith.constant 0 : i32
    return %c0_i32, %c0_i32_0 : i32, i32
  }
  func.func @transform_7(%arg0: i32) -> (i32, i32) {
    %c0_i32 = arith.constant 0 : i32
    %c0_i32_0 = arith.constant 0 : i32
    %c0_i32_1 = arith.constant 0 : i32
    return %c0_i32, %c0_i32_0 : i32, i32
  }
  func.func @transform_8(%arg0: i32) -> (i32, i32) {
    %c0_i32 = arith.constant 0 : i32
    %c0_i32_0 = arith.constant 0 : i32
    %c0_i32_1 = arith.constant 0 : i32
    return %c0_i32, %c0_i32_0 : i32, i32
  }
  func.func @transform_9(%arg0: i32) -> (i32, i32) {
    %c0_i32 = arith.constant 0 : i32
    %c0_i32_0 = arith.constant 0 : i32
    %c0_i32_1 = arith.constant 0 : i32
    return %c0_i32, %c0_i32_0 : i32, i32
  }
  func.func @transform_10(%arg0: i32) -> (i32, i32) {
    %c0_i32 = arith.constant 0 : i32
    %c0_i32_0 = arith.constant 0 : i32
    %c0_i32_1 = arith.constant 0 : i32
    return %c0_i32, %c0_i32_0 : i32, i32
  }
  func.func @transform_11(%arg0: i32) -> (i32, i32) {
    %c0_i32 = arith.constant 0 : i32
    %c0_i32_0 = arith.constant 0 : i32
    %c0_i32_1 = arith.constant 0 : i32
    return %c0_i32, %c0_i32_0 : i32, i32
  }
  func.func @transform_12(%arg0: i32) -> (i32, i32) {
    %c0_i32 = arith.constant 0 : i32
    %c0_i32_0 = arith.constant 0 : i32
    %c0_i32_1 = arith.constant 0 : i32
    return %c0_i32, %c0_i32_0 : i32, i32
  }
  func.func @transform_13(%arg0: i32) -> (i32, i32, i32) {
    %c0_i32 = arith.constant 0 : i32
    %c0_i32_0 = arith.constant 0 : i32
    %c0_i32_1 = arith.constant 0 : i32
    return %arg0, %c0_i32, %c0_i32_0 : i32, i32, i32
  }
}

module attributes {stable_mosaic.version = 11 : i64} {
  func.func @_encoder_block_kernel(%arg0: i32, %arg1: memref<1x8x32xf32, #tpu.memory_space<vmem>>, %arg2: memref<32x96xbf16, #tpu.memory_space<vmem>>, %arg3: memref<1x96xf32, #tpu.memory_space<vmem>>, %arg4: memref<4x8x32xbf16, #tpu.memory_space<vmem>>, %arg5: memref<1x32xf32, #tpu.memory_space<vmem>>, %arg6: memref<1x32xf32, #tpu.memory_space<vmem>>, %arg7: memref<1x32xf32, #tpu.memory_space<vmem>>, %arg8: memref<32x128xbf16, #tpu.memory_space<vmem>>, %arg9: memref<1x128xf32, #tpu.memory_space<vmem>>, %arg10: memref<128x32xbf16, #tpu.memory_space<vmem>>, %arg11: memref<1x32xf32, #tpu.memory_space<vmem>>, %arg12: memref<1x32xf32, #tpu.memory_space<vmem>>, %arg13: memref<1x32xf32, #tpu.memory_space<vmem>>, %arg14: memref<1x8x32xf32, #tpu.memory_space<vmem>>) attributes {dimension_semantics = [#tpu.dimension_semantics<parallel>], iteration_bounds = array<i64: 2>, scalar_prefetch = 0 : i64, scratch_operands = 0 : i64, tpu.core_type = #tpu.core_type<tc>, window_params = [{transform_indices = @transform_0, window_bounds = array<i64: 1, 8, 32>}, {pipeline_mode = #tpu.pipeline_mode<synchronous>, transform_indices = @transform_1, window_bounds = array<i64: 32, 96>}, {pipeline_mode = #tpu.pipeline_mode<synchronous>, transform_indices = @transform_2, window_bounds = array<i64: 1, 96>}, {pipeline_mode = #tpu.pipeline_mode<synchronous>, transform_indices = @transform_3, window_bounds = array<i64: 4, 8, 32>}, {pipeline_mode = #tpu.pipeline_mode<synchronous>, transform_indices = @transform_4, window_bounds = array<i64: 1, 32>}, {pipeline_mode = #tpu.pipeline_mode<synchronous>, transform_indices = @transform_5, window_bounds = array<i64: 1, 32>}, {pipeline_mode = #tpu.pipeline_mode<synchronous>, transform_indices = @transform_6, window_bounds = array<i64: 1, 32>}, {pipeline_mode = #tpu.pipeline_mode<synchronous>, transform_indices = @transform_7, window_bounds = array<i64: 32, 128>}, {pipeline_mode = #tpu.pipeline_mode<synchronous>, transform_indices = @transform_8, window_bounds = array<i64: 1, 128>}, {pipeline_mode = #tpu.pipeline_mode<synchronous>, transform_indices = @transform_9, window_bounds = array<i64: 128, 32>}, {pipeline_mode = #tpu.pipeline_mode<synchronous>, transform_indices = @transform_10, window_bounds = array<i64: 1, 32>}, {pipeline_mode = #tpu.pipeline_mode<synchronous>, transform_indices = @transform_11, window_bounds = array<i64: 1, 32>}, {pipeline_mode = #tpu.pipeline_mode<synchronous>, transform_indices = @transform_12, window_bounds = array<i64: 1, 32>}, {transform_indices = @transform_13, window_bounds = array<i64: 1, 8, 32>}]} {
    %c0 = arith.constant 0 : index
    %c0_0 = arith.constant 0 : index
    %c0_1 = arith.constant 0 : index
    %0 = vector.load %arg1[%c0, %c0_0, %c0_1] : memref<1x8x32xf32, #tpu.memory_space<vmem>>, vector<1x8x32xf32>
    %1 = vector.shape_cast %0 : vector<1x8x32xf32> to vector<8x32xf32>
    %2 = arith.truncf %1 : vector<8x32xf32> to vector<8x32xbf16>
    %c0_2 = arith.constant 0 : index
    %c0_3 = arith.constant 0 : index
    %3 = vector.load %arg2[%c0_2, %c0_3] : memref<32x96xbf16, #tpu.memory_space<vmem>>, vector<32x96xbf16>
    %cst = arith.constant dense<0.000000e+00> : vector<8x96xf32>
    %4 = tpu.matmul %2, %3, %cst {dimension_numbers = #tpu.dot_dimension_numbers<[1], [0], [0], [1], [0, 0, 1, 1], [], []>} : vector<8x32xbf16>, vector<32x96xbf16>, vector<8x96xf32> -> vector<8x96xf32>
    %c0_4 = arith.constant 0 : index
    %c0_5 = arith.constant 0 : index
    %5 = vector.load %arg3[%c0_4, %c0_5] : memref<1x96xf32, #tpu.memory_space<vmem>>, vector<1x96xf32>
    %6 = vector.broadcast %5 : vector<1x96xf32> to vector<8x96xf32>
    %7 = arith.addf %4, %6 : vector<8x96xf32>
    %8 = vector.extract_strided_slice %7 {offsets = [0, 0], sizes = [8, 32], strides = [1, 1]} : vector<8x96xf32> to vector<8x32xf32>
    %cst_6 = arith.constant 0.353553385 : f32
    %9 = vector.broadcast %cst_6 : f32 to vector<8x32xf32>
    %10 = arith.mulf %8, %9 : vector<8x32xf32>
    %11 = vector.extract_strided_slice %7 {offsets = [0, 32], sizes = [8, 32], strides = [1, 1]} : vector<8x96xf32> to vector<8x32xf32>
    %12 = vector.extract_strided_slice %7 {offsets = [0, 64], sizes = [8, 32], strides = [1, 1]} : vector<8x96xf32> to vector<8x32xf32>
    %13 = vector.extract_strided_slice %10 {offsets = [0, 0], sizes = [8, 8], strides = [1, 1]} : vector<8x32xf32> to vector<8x8xf32>
    %14 = vector.extract_strided_slice %10 {offsets = [0, 8], sizes = [8, 8], strides = [1, 1]} : vector<8x32xf32> to vector<8x8xf32>
    %15 = vector.extract_strided_slice %10 {offsets = [0, 16], sizes = [8, 8], strides = [1, 1]} : vector<8x32xf32> to vector<8x8xf32>
    %16 = vector.extract_strided_slice %10 {offsets = [0, 24], sizes = [8, 8], strides = [1, 1]} : vector<8x32xf32> to vector<8x8xf32>
    %17 = vector.shape_cast %13 : vector<8x8xf32> to vector<1x8x8xf32>
    %18 = vector.shape_cast %14 : vector<8x8xf32> to vector<1x8x8xf32>
    %19 = vector.shape_cast %15 : vector<8x8xf32> to vector<1x8x8xf32>
    %20 = vector.shape_cast %16 : vector<8x8xf32> to vector<1x8x8xf32>
    %21 = tpu.concatenate %17, %18, %19, %20 in 0 : vector<1x8x8xf32>, vector<1x8x8xf32>, vector<1x8x8xf32>, vector<1x8x8xf32> -> vector<4x8x8xf32>
    %22 = vector.shape_cast %21 : vector<4x8x8xf32> to vector<4x1x8x8xf32>
    %23 = vector.shape_cast %22 : vector<4x1x8x8xf32> to vector<4x8x8xf32>
    %24 = arith.truncf %23 : vector<4x8x8xf32> to vector<4x8x8xbf16>
    %25 = vector.extract_strided_slice %11 {offsets = [0, 0], sizes = [8, 8], strides = [1, 1]} : vector<8x32xf32> to vector<8x8xf32>
    %26 = vector.extract_strided_slice %11 {offsets = [0, 8], sizes = [8, 8], strides = [1, 1]} : vector<8x32xf32> to vector<8x8xf32>
    %27 = vector.extract_strided_slice %11 {offsets = [0, 16], sizes = [8, 8], strides = [1, 1]} : vector<8x32xf32> to vector<8x8xf32>
    %28 = vector.extract_strided_slice %11 {offsets = [0, 24], sizes = [8, 8], strides = [1, 1]} : vector<8x32xf32> to vector<8x8xf32>
    %29 = vector.shape_cast %25 : vector<8x8xf32> to vector<1x8x8xf32>
    %30 = vector.shape_cast %26 : vector<8x8xf32> to vector<1x8x8xf32>
    %31 = vector.shape_cast %27 : vector<8x8xf32> to vector<1x8x8xf32>
    %32 = vector.shape_cast %28 : vector<8x8xf32> to vector<1x8x8xf32>
    %33 = tpu.concatenate %29, %30, %31, %32 in 0 : vector<1x8x8xf32>, vector<1x8x8xf32>, vector<1x8x8xf32>, vector<1x8x8xf32> -> vector<4x8x8xf32>
    %34 = vector.shape_cast %33 : vector<4x8x8xf32> to vector<4x1x8x8xf32>
    %35 = vector.shape_cast %34 : vector<4x1x8x8xf32> to vector<4x8x8xf32>
    %36 = arith.truncf %35 : vector<4x8x8xf32> to vector<4x8x8xbf16>
    %37 = vector.extract_strided_slice %12 {offsets = [0, 0], sizes = [8, 8], strides = [1, 1]} : vector<8x32xf32> to vector<8x8xf32>
    %38 = vector.extract_strided_slice %12 {offsets = [0, 8], sizes = [8, 8], strides = [1, 1]} : vector<8x32xf32> to vector<8x8xf32>
    %39 = vector.extract_strided_slice %12 {offsets = [0, 16], sizes = [8, 8], strides = [1, 1]} : vector<8x32xf32> to vector<8x8xf32>
    %40 = vector.extract_strided_slice %12 {offsets = [0, 24], sizes = [8, 8], strides = [1, 1]} : vector<8x32xf32> to vector<8x8xf32>
    %41 = vector.shape_cast %37 : vector<8x8xf32> to vector<1x8x8xf32>
    %42 = vector.shape_cast %38 : vector<8x8xf32> to vector<1x8x8xf32>
    %43 = vector.shape_cast %39 : vector<8x8xf32> to vector<1x8x8xf32>
    %44 = vector.shape_cast %40 : vector<8x8xf32> to vector<1x8x8xf32>
    %45 = tpu.concatenate %41, %42, %43, %44 in 0 : vector<1x8x8xf32>, vector<1x8x8xf32>, vector<1x8x8xf32>, vector<1x8x8xf32> -> vector<4x8x8xf32>
    %46 = vector.shape_cast %45 : vector<4x8x8xf32> to vector<4x1x8x8xf32>
    %47 = vector.shape_cast %46 : vector<4x1x8x8xf32> to vector<4x8x8xf32>
    %48 = arith.truncf %47 : vector<4x8x8xf32> to vector<4x8x8xbf16>
    "tpu.trace_start"() <{level = 10 : i32, message = "bqd,bkd->bqk"}> : () -> ()
    %cst_7 = arith.constant dense<0.000000e+00> : vector<4x8x8xf32>
    %49 = tpu.matmul %24, %36, %cst_7 {dimension_numbers = #tpu.dot_dimension_numbers<[2], [2], [1], [1], [0, 0, 0, 1, 1, 1], [0], [0]>} : vector<4x8x8xbf16>, vector<4x8x8xbf16>, vector<4x8x8xf32> -> vector<4x8x8xf32>
    "tpu.trace_stop"() : () -> ()
    %cst_8 = arith.constant dense<0xFF800000> : vector<4x8xf32>
    %50 = vector.multi_reduction <maximumf>, %49, %cst_8 [2] : vector<4x8x8xf32> to vector<4x8xf32>
    %51 = vector.shape_cast %50 : vector<4x8xf32> to vector<4x8x1xf32>
    %52 = vector.broadcast %51 : vector<4x8x1xf32> to vector<4x8x8xf32>
    %53 = arith.subf %49, %52 : vector<4x8x8xf32>
    %54 = math.exp %53 : vector<4x8x8xf32>
    %cst_9 = arith.constant dense<0.000000e+00> : vector<4x8xf32>
    %55 = vector.multi_reduction <add>, %54, %cst_9 [2] : vector<4x8x8xf32> to vector<4x8xf32>
    %56 = vector.shape_cast %55 : vector<4x8xf32> to vector<4x8x1xf32>
    %57 = tpu.reciprocal %56 {approx = true} : vector<4x8x1xf32> -> vector<4x8x1xf32>
    %58 = vector.broadcast %57 : vector<4x8x1xf32> to vector<4x8x8xf32>
    %59 = arith.mulf %54, %58 : vector<4x8x8xf32>
    %60 = arith.truncf %59 : vector<4x8x8xf32> to vector<4x8x8xbf16>
    "tpu.trace_start"() <{level = 10 : i32, message = "bqk,bkd->bqd"}> : () -> ()
    %cst_10 = arith.constant dense<0.000000e+00> : vector<4x8x8xf32>
    %61 = tpu.matmul %60, %48, %cst_10 {dimension_numbers = #tpu.dot_dimension_numbers<[2], [1], [1], [2], [0, 0, 0, 1, 1, 2], [0], [0]>} : vector<4x8x8xbf16>, vector<4x8x8xbf16>, vector<4x8x8xf32> -> vector<4x8x8xf32>
    "tpu.trace_stop"() : () -> ()
    %62 = vector.shape_cast %61 : vector<4x8x8xf32> to vector<4x1x8x8xf32>
    %63 = vector.shape_cast %62 : vector<4x1x8x8xf32> to vector<4x8x8xf32>
    %64 = arith.truncf %63 : vector<4x8x8xf32> to vector<4x8x8xbf16>
    %c0_11 = arith.constant 0 : index
    %c0_12 = arith.constant 0 : index
    %c0_13 = arith.constant 0 : index
    %65 = vector.load %arg4[%c0_11, %c0_12, %c0_13] : memref<4x8x32xbf16, #tpu.memory_space<vmem>>, vector<4x8x32xbf16>
    "tpu.trace_start"() <{level = 10 : i32, message = "hmd,hdn->hmn"}> : () -> ()
    %cst_14 = arith.constant dense<0.000000e+00> : vector<4x8x32xf32>
    %66 = tpu.matmul %64, %65, %cst_14 {dimension_numbers = #tpu.dot_dimension_numbers<[2], [1], [1], [2], [0, 0, 0, 1, 1, 2], [0], [0]>} : vector<4x8x8xbf16>, vector<4x8x32xbf16>, vector<4x8x32xf32> -> vector<4x8x32xf32>
    "tpu.trace_stop"() : () -> ()
    %cst_15 = arith.constant dense<0.000000e+00> : vector<8x32xf32>
    %67 = vector.multi_reduction <add>, %66, %cst_15 [0] : vector<4x8x32xf32> to vector<8x32xf32>
    %c0_16 = arith.constant 0 : index
    %c0_17 = arith.constant 0 : index
    %68 = vector.load %arg5[%c0_16, %c0_17] : memref<1x32xf32, #tpu.memory_space<vmem>>, vector<1x32xf32>
    %69 = vector.broadcast %68 : vector<1x32xf32> to vector<8x32xf32>
    %70 = arith.addf %67, %69 : vector<8x32xf32>
    %71 = arith.addf %1, %70 : vector<8x32xf32>
    %cst_18 = arith.constant dense<0.000000e+00> : vector<8xf32>
    %72 = vector.multi_reduction <add>, %71, %cst_18 [1] : vector<8x32xf32> to vector<8xf32>
    %73 = vector.shape_cast %72 : vector<8xf32> to vector<8x1xf32>
    %cst_19 = arith.constant 3.200000e+01 : f32
    %74 = vector.broadcast %cst_19 : f32 to vector<8x1xf32>
    %75 = arith.divf %73, %74 : vector<8x1xf32>
    %76 = vector.broadcast %75 : vector<8x1xf32> to vector<8x32xf32>
    %77 = arith.subf %71, %76 : vector<8x32xf32>
    %78 = arith.mulf %77, %77 : vector<8x32xf32>
    %cst_20 = arith.constant dense<0.000000e+00> : vector<8xf32>
    %79 = vector.multi_reduction <add>, %78, %cst_20 [1] : vector<8x32xf32> to vector<8xf32>
    %80 = vector.shape_cast %79 : vector<8xf32> to vector<8x1xf32>
    %cst_21 = arith.constant 3.200000e+01 : f32
    %81 = vector.broadcast %cst_21 : f32 to vector<8x1xf32>
    %82 = arith.divf %80, %81 : vector<8x1xf32>
    %83 = vector.broadcast %75 : vector<8x1xf32> to vector<8x32xf32>
    %84 = arith.subf %71, %83 : vector<8x32xf32>
    %cst_22 = arith.constant 9.99999974E-6 : f32
    %85 = vector.broadcast %cst_22 : f32 to vector<8x1xf32>
    %86 = arith.addf %82, %85 : vector<8x1xf32>
    %87 = math.rsqrt %86 : vector<8x1xf32>
    %88 = vector.broadcast %87 : vector<8x1xf32> to vector<8x32xf32>
    %89 = arith.mulf %84, %88 : vector<8x32xf32>
    %c0_23 = arith.constant 0 : index
    %c0_24 = arith.constant 0 : index
    %90 = vector.load %arg6[%c0_23, %c0_24] : memref<1x32xf32, #tpu.memory_space<vmem>>, vector<1x32xf32>
    %91 = vector.broadcast %90 : vector<1x32xf32> to vector<8x32xf32>
    %92 = arith.mulf %89, %91 : vector<8x32xf32>
    %c0_25 = arith.constant 0 : index
    %c0_26 = arith.constant 0 : index
    %93 = vector.load %arg7[%c0_25, %c0_26] : memref<1x32xf32, #tpu.memory_space<vmem>>, vector<1x32xf32>
    %94 = vector.broadcast %93 : vector<1x32xf32> to vector<8x32xf32>
    %95 = arith.addf %92, %94 : vector<8x32xf32>
    %96 = arith.truncf %95 : vector<8x32xf32> to vector<8x32xbf16>
    %c0_27 = arith.constant 0 : index
    %c0_28 = arith.constant 0 : index
    %97 = vector.load %arg8[%c0_27, %c0_28] : memref<32x128xbf16, #tpu.memory_space<vmem>>, vector<32x128xbf16>
    %cst_29 = arith.constant dense<0.000000e+00> : vector<8x128xf32>
    %98 = tpu.matmul %96, %97, %cst_29 {dimension_numbers = #tpu.dot_dimension_numbers<[1], [0], [0], [1], [0, 0, 1, 1], [], []>} : vector<8x32xbf16>, vector<32x128xbf16>, vector<8x128xf32> -> vector<8x128xf32>
    %c0_30 = arith.constant 0 : index
    %c0_31 = arith.constant 0 : index
    %99 = vector.load %arg9[%c0_30, %c0_31] : memref<1x128xf32, #tpu.memory_space<vmem>>, vector<1x128xf32>
    %100 = vector.broadcast %99 : vector<1x128xf32> to vector<8x128xf32>
    %101 = arith.addf %98, %100 : vector<8x128xf32>
    %cst_32 = arith.constant 0.000000e+00 : f32
    %102 = vector.broadcast %cst_32 : f32 to vector<8x128xf32>
    %103 = arith.maximumf %101, %102 : vector<8x128xf32>
    %104 = arith.truncf %103 : vector<8x128xf32> to vector<8x128xbf16>
    %c0_33 = arith.constant 0 : index
    %c0_34 = arith.constant 0 : index
    %105 = vector.load %arg10[%c0_33, %c0_34] : memref<128x32xbf16, #tpu.memory_space<vmem>>, vector<128x32xbf16>
    %cst_35 = arith.constant dense<0.000000e+00> : vector<8x32xf32>
    %106 = tpu.matmul %104, %105, %cst_35 {dimension_numbers = #tpu.dot_dimension_numbers<[1], [0], [0], [1], [0, 0, 1, 1], [], []>} : vector<8x128xbf16>, vector<128x32xbf16>, vector<8x32xf32> -> vector<8x32xf32>
    %c0_36 = arith.constant 0 : index
    %c0_37 = arith.constant 0 : index
    %107 = vector.load %arg11[%c0_36, %c0_37] : memref<1x32xf32, #tpu.memory_space<vmem>>, vector<1x32xf32>
    %108 = vector.broadcast %107 : vector<1x32xf32> to vector<8x32xf32>
    %109 = arith.addf %106, %108 : vector<8x32xf32>
    %110 = arith.addf %95, %109 : vector<8x32xf32>
    %cst_38 = arith.constant dense<0.000000e+00> : vector<8xf32>
    %111 = vector.multi_reduction <add>, %110, %cst_38 [1] : vector<8x32xf32> to vector<8xf32>
    %112 = vector.shape_cast %111 : vector<8xf32> to vector<8x1xf32>
    %cst_39 = arith.constant 3.200000e+01 : f32
    %113 = vector.broadcast %cst_39 : f32 to vector<8x1xf32>
    %114 = arith.divf %112, %113 : vector<8x1xf32>
    %115 = vector.broadcast %114 : vector<8x1xf32> to vector<8x32xf32>
    %116 = arith.subf %110, %115 : vector<8x32xf32>
    %117 = arith.mulf %116, %116 : vector<8x32xf32>
    %cst_40 = arith.constant dense<0.000000e+00> : vector<8xf32>
    %118 = vector.multi_reduction <add>, %117, %cst_40 [1] : vector<8x32xf32> to vector<8xf32>
    %119 = vector.shape_cast %118 : vector<8xf32> to vector<8x1xf32>
    %cst_41 = arith.constant 3.200000e+01 : f32
    %120 = vector.broadcast %cst_41 : f32 to vector<8x1xf32>
    %121 = arith.divf %119, %120 : vector<8x1xf32>
    %122 = vector.broadcast %114 : vector<8x1xf32> to vector<8x32xf32>
    %123 = arith.subf %110, %122 : vector<8x32xf32>
    %cst_42 = arith.constant 9.99999974E-6 : f32
    %124 = vector.broadcast %cst_42 : f32 to vector<8x1xf32>
    %125 = arith.addf %121, %124 : vector<8x1xf32>
    %126 = math.rsqrt %125 : vector<8x1xf32>
    %127 = vector.broadcast %126 : vector<8x1xf32> to vector<8x32xf32>
    %128 = arith.mulf %123, %127 : vector<8x32xf32>
    %c0_43 = arith.constant 0 : index
    %c0_44 = arith.constant 0 : index
    %129 = vector.load %arg12[%c0_43, %c0_44] : memref<1x32xf32, #tpu.memory_space<vmem>>, vector<1x32xf32>
    %130 = vector.broadcast %129 : vector<1x32xf32> to vector<8x32xf32>
    %131 = arith.mulf %128, %130 : vector<8x32xf32>
    %c0_45 = arith.constant 0 : index
    %c0_46 = arith.constant 0 : index
    %132 = vector.load %arg13[%c0_45, %c0_46] : memref<1x32xf32, #tpu.memory_space<vmem>>, vector<1x32xf32>
    %133 = vector.broadcast %132 : vector<1x32xf32> to vector<8x32xf32>
    %134 = arith.addf %131, %133 : vector<8x32xf32>
    %135 = vector.shape_cast %134 : vector<8x32xf32> to vector<1x8x32xf32>
    %c0_47 = arith.constant 0 : index
    %c0_48 = arith.constant 0 : index
    %c0_49 = arith.constant 0 : index
    %136 = vector.load %arg14[%c0_47, %c0_48, %c0_49] : memref<1x8x32xf32, #tpu.memory_space<vmem>>, vector<1x8x32xf32>
    tpu.vector_store %arg14[%c0_47, %c0_48, %c0_49], %135 {strides = array<i32>} : memref<1x8x32xf32, #tpu.memory_space<vmem>>, vector<1x8x32xf32>,
    return
  }
  func.func @transform_0(%arg0: i32) -> (i32, i32, i32) {
    %c0_i32 = arith.constant 0 : i32
    %c0_i32_0 = arith.constant 0 : i32
    %c0_i32_1 = arith.constant 0 : i32
    return %arg0, %c0_i32, %c0_i32_0 : i32, i32, i32
  }
  func.func @transform_1(%arg0: i32) -> (i32, i32) {
    %c0_i32 = arith.constant 0 : i32
    %c0_i32_0 = arith.constant 0 : i32
    %c0_i32_1 = arith.constant 0 : i32
    return %c0_i32, %c0_i32_0 : i32, i32
  }
  func.func @transform_2(%arg0: i32) -> (i32, i32) {
    %c0_i32 = arith.constant 0 : i32
    %c0_i32_0 = arith.constant 0 : i32
    %c0_i32_1 = arith.constant 0 : i32
    return %c0_i32, %c0_i32_0 : i32, i32
  }
  func.func @transform_3(%arg0: i32) -> (i32, i32, i32) {
    %c0_i32 = arith.constant 0 : i32
    %c0_i32_0 = arith.constant 0 : i32
    %c0_i32_1 = arith.constant 0 : i32
    %c0_i32_2 = arith.constant 0 : i32
    return %c0_i32, %c0_i32_0, %c0_i32_1 : i32, i32, i32
  }
  func.func @transform_4(%arg0: i32) -> (i32, i32) {
    %c0_i32 = arith.constant 0 : i32
    %c0_i32_0 = arith.constant 0 : i32
    %c0_i32_1 = arith.constant 0 : i32
    return %c0_i32, %c0_i32_0 : i32, i32
  }
  func.func @transform_5(%arg0: i32) -> (i32, i32) {
    %c0_i32 = arith.constant 0 : i32
    %c0_i32_0 = arith.constant 0 : i32
    %c0_i32_1 = arith.constant 0 : i32
    return %c0_i32, %c0_i32_0 : i32, i32
  }
  func.func @transform_6(%arg0: i32) -> (i32, i32) {
    %c0_i32 = arith.constant 0 : i32
    %c0_i32_0 = arith.constant 0 : i32
    %c0_i32_1 = arith.constant 0 : i32
    return %c0_i32, %c0_i32_0 : i32, i32
  }
  func.func @transform_7(%arg0: i32) -> (i32, i32) {
    %c0_i32 = arith.constant 0 : i32
    %c0_i32_0 = arith.constant 0 : i32
    %c0_i32_1 = arith.constant 0 : i32
    return %c0_i32, %c0_i32_0 : i32, i32
  }
  func.func @transform_8(%arg0: i32) -> (i32, i32) {
    %c0_i32 = arith.constant 0 : i32
    %c0_i32_0 = arith.constant 0 : i32
    %c0_i32_1 = arith.constant 0 : i32
    return %c0_i32, %c0_i32_0 : i32, i32
  }
  func.func @transform_9(%arg0: i32) -> (i32, i32) {
    %c0_i32 = arith.constant 0 : i32
    %c0_i32_0 = arith.constant 0 : i32
    %c0_i32_1 = arith.constant 0 : i32
    return %c0_i32, %c0_i32_0 : i32, i32
  }
  func.func @transform_10(%arg0: i32) -> (i32, i32) {
    %c0_i32 = arith.constant 0 : i32
    %c0_i32_0 = arith.constant 0 : i32
    %c0_i32_1 = arith.constant 0 : i32
    return %c0_i32, %c0_i32_0 : i32, i32
  }
  func.func @transform_11(%arg0: i32) -> (i32, i32) {
    %c0_i32 = arith.constant 0 : i32
    %c0_i32_0 = arith.constant 0 : i32
    %c0_i32_1 = arith.constant 0 : i32
    return %c0_i32, %c0_i32_0 : i32, i32
  }
  func.func @transform_12(%arg0: i32) -> (i32, i32) {
    %c0_i32 = arith.constant 0 : i32
    %c0_i32_0 = arith.constant 0 : i32
    %c0_i32_1 = arith.constant 0 : i32
    return %c0_i32, %c0_i32_0 : i32, i32
  }
  func.func @transform_13(%arg0: i32) -> (i32, i32, i32) {
    %c0_i32 = arith.constant 0 : i32
    %c0_i32_0 = arith.constant 0 : i32
    %c0_i32_1 = arith.constant 0 : i32
    return %arg0, %c0_i32, %c0_i32_0 : i32, i32, i32
  }
}

</mosaic_0001>

<bundles_post_ra>
// kernel: tpu_custom_call.1
= control target key start
LH: loop header
LB: loop body
LE: loop exit
PB: predicated region body
PF: predicated region fallthrough
CT: control target
= control target key end

     0   :  { %s1622_s0 = inlined_call_operand.vmem [shape: f32[2,8,32], index: 0, kind: input, shape index: {}]   ;;  %s1623_s1 = inlined_call_operand.vmem [shape: bf16[32,96], index: 1, kind: input, shape index: {}]   ;;  %s1624_s2 = inlined_call_operand.vmem [shape: f32[1,96], index: 2, kind: input, shape index: {}]   ;;  %s1625_s3 = inlined_call_operand.vmem [shape: bf16[4,8,32], index: 3, kind: input, shape index: {}]   ;;  %s1626_s4 = inlined_call_operand.vmem [shape: f32[1,32], index: 4, kind: input, shape index: {}]   ;;  %s1627_s5 = inlined_call_operand.vmem [shape: f32[1,32], index: 5, kind: input, shape index: {}]   ;;  %s1628_s6 = inlined_call_operand.vmem [shape: f32[1,32], index: 6, kind: input, shape index: {}]   ;;  %s1629_s7 = inlined_call_operand.vmem [shape: bf16[32,128], index: 7, kind: input, shape index: {}]   ;;  %s1630_s8 = inlined_call_operand.vmem [shape: f32[1,128], index: 8, kind: input, shape index: {}]   ;;  %s1631_s9 = inlined_call_operand.vmem [shape: bf16[128,32], index: 9, kind: input, shape index: {}]   ;;  %s1632_s10 = inlined_call_operand.vmem [shape: f32[1,32], index: 10, kind: input, shape index: {}]   ;;  %s1633_s11 = inlined_call_operand.vmem [shape: f32[1,32], index: 11, kind: input, shape index: {}]   ;;  %s1634_s12 = inlined_call_operand.vmem [shape: f32[1,32], index: 12, kind: input, shape index: {}]   ;;  %s1635_s13 = inlined_call_operand.hbm [shape: f32[2,8,32], index: 13, kind: output, shape index: {}]  }
   0x1   :  { %1636 = sst [smem:[#allocation6_spill]] %s1622_s0 }
   0x2   :  { %1637 = sst [smem:[#allocation7_spill]] %s1623_s1 }
   0x3   :  { %1638 = sst [smem:[#allocation8_spill]] %s1624_s2 }
   0x4   :  { %18 = vsyncpa [#allocation3], 0 }
   0x5   :  { %20 = vsyncpa [#allocation3 + $0x1], 0  ;;  %s1399_s25 = smov 0   ;;  %s1401_s26 = smov 0  }
   0x6   :  { %s1403_s27 = smov 0   ;;  %s1405_s28 = smov 0  }
   0x7 LB: > { %s1420_s29 = sadd.s32 4294967295, %s1321_s28   ;;  %s1100_s30 = sadd.s32 4294967294, %s1321_s28   ;;  %s1321_s28 = sphi %s1405_s28, %s1649_s28   ;;  %s1317_s27 = sphi %s1403_s27, %s1648_s27   ;;  %s1313_s26 = sphi %s1401_s26, %s1647_s26   ;;  %s1309_s25 = sphi %s1399_s25, %s1646_s25  }
   0x8   : > { %s1424_s14 = sadd.s32 1, %s1321_s28   ;;  %s311_s15 = sadd.s32 1, %s1317_s27 }
   0x9   : > { %s308_s16 = ssub.s32 %s1321_s28, %s1424_s14  ;;  %p321_p0 = scmp.ne.s32.totalorder %s1317_s27, %s1313_s26 }
   0xa   : > { %p309_p1 = scmp.eq.s32.totalorder %s308_s16, 0  ;;  %p322_p2 = scmp.eq.s32.totalorder %s1420_s29, 1 }
   0xb   : > { %p327_p3 = scmp.ne.s32.totalorder %s1313_s26, %s1309_s25  ;;  %p328_p4 = scmp.eq.s32.totalorder %s1100_s30, 1 }
   0xc   : > { %s1435_s17 = scalar_select %p309_p1, %s1317_s27, %s311_s15  }
   0xd   : > { %p1437_p5 = por %p322_p2, %p321_p0  ;;  %p1441_p6 = por %p328_p4, %p327_p3 }
   0xe   : > { %1639 = sst [smem:[#allocation5_spill]] %s1435_s17  ;;  %p1103_p7 = scmp.ge.s32.totalorder %s1321_s28, 1 }
   0xf   : > { %p389_p8 = scmp.lt.s32.totalorder %s1321_s28, 3 }
  0x11   : > { %p390_p9 = pnand %p1103_p7, %p389_p8 }
  0x12   : > { %s1642_s1 = sld [smem:[#allocation7_spill]] (!%p390_p9)  ;;  %p432_p10 = scmp.lt.s32.totalorder (!%p390_p9), %s1420_s29, 1 }
  0x13   : > { %393 = sbr.rel (%p390_p9) target bundleno = 1908 (0x774), region = 72  ;;  %s1643_s0 = sld [smem:[#allocation6_spill]] (!%p390_p9) }
  0x14   : > { %s1644_s2 = sld [smem:[#allocation8_spill]] (!%p390_p9)  ;;  %s1323_s22 = smov (!%p390_p9), 104  }
  0x15   : > { %s1324_s23 = smov (!%p390_p9), 120   ;;  %s429_s20 = sand.u32 (!%p390_p9), 1, %s1313_s26  }
  0x16   : > { %s1104_s21 = sshll.u32 (!%p390_p9), %s429_s20, 3 }
  0x18   : > { %v1173_v0 = vld [vmem:[%s1642_s1 + $0x8] sm:$0xff]  ;;  %v1172_v1 = vld [vmem:[%s1642_s1] sm:$0xff]  ;;  %s433_s24 = scalar_select %p432_p10, %s1420_s29, 1  ;;  %vm459_vm0 = vcmask 261120   ;;  %vm510_vm1 = vcmask 64512   ;;  %vm655_vm2 = vcmask 1043456  }
  0x19   : > { %469 = vmatpush.bf16.msra.mxu0 %v1173_v0  ;;  %s431_s1 = scalar_lea.vmem [#allocation2], %s1104_s21  ;;  %s1279_s21 = scalar_lea.hbm %s1635_s13, 16 }
  0x1a   : > { %s1105_s30 = sshll.u32 %s433_s24, 3  ;;  %v1229_v4 = vld [vmem:[%s1644_s2] ss:$0 sm:$0xff]  ;;  %s1326_s24 = smov 96  }
  0x1b   : > { %s435_s17 = scalar_lea.vmem %s1643_s0, %s1105_s30  ;;  %s1327_s30 = smov 64  }
  0x1c   : > { %v1458_v2 = vld [vmem:[%s435_s17] sm:$0xff]  ;;  %s1325_s17 = smov 112  }
  0x1d   : > { %470 = vmatpush.bf16.msra.mxu0 %v1172_v1  ;;  %v438_v3 = vpack.c.bf16 %v1458_v2, %v1458_v2 }
  0x20   : > { %1114 = vmatmul.msk.bf16.vlgmr.msra.gmra.mxu0 %vm459_vm0, %v438_v3 }
  0x9d   : > { %v472_v5 = vpop.f32.mrf.mxu0 }
  0x9e   : > { %v473_v6 = vadd.f32 %v1229_v4, %v472_v5 }
  0xa0   : > { %498 = vrot.lane.b32.xlu1 %v473_v6, %s1323_s22  ;;  %492 = vrot.lane.b32.xlu0 %v473_v6, %s1324_s23  ;;  %v476_v7 = vmul.f32 0.35355338, %v473_v6  ;;  %v501_v13 = vpack.c.bf16 %v473_v6, %v473_v6 }
  0xa2   : > { %478 = vrot.lane.b32.xlu2 %v476_v7, %s1324_s23  ;;  %v506_v16 = vunpack.c.l.b16 %v501_v13  ;;  %v487_v37 = vpack.c.bf16 %v476_v7, %v476_v7  ;;  %s1026_s23 = scalar_lea.sflag [#allocation3], %s429_s20 }
  0xa4   : > { %v507_v21 = vpack.c.b16 %v506_v16, %v506_v16 }
  0xa5   : > { %v474_v8 = vpop.f32.mrf.mxu0 }
  0xa8   : > { %495 = vrot.lane.b32.xlu0 %v473_v6, %s1325_s17 }
  0xb0   : > { %481 = vrot.lane.b32.xlu0 %v476_v7, %s1325_s17 }
  0xb8   : > { %484 = vrot.lane.b32.xlu0 %v476_v7, %s1323_s22  ;;  %s1169_s22 = sshll.u32 %s1420_s29, 3  ;;  %s1038_s29 = sshll.u32 %s431_s1, 4  ;;  %s1039_s29 = int_to_ptr.vmem [resolvable:$true] %s1038_s29 }
  0xb9   : > { %s1036_s15 = scalar_lea.hbm %s1635_s13, %s1169_s22 }
  0xba   : > { %s1040_s2 = sshll.u32 %s1036_s15, 4  ;;  %s1041_s2 = int_to_ptr.hbm [resolvable:$true] %s1040_s2 }
  0xbb   : > { %s1273_s17 = sshra.s32 %s1041_s2, 4  ;;  %s1274_s17 = int_to_ptr.hbm [resolvable:$true] %s1273_s17 }
  0xbc   : > { %s1275_s22 = scalar_lea.hbm %s1274_s17, 8  ;;  %p1280_p0 = scmp.lt.s32.totalorder %s1274_s17, %s1635_s13 }
  0xbd   : > { %p1276_p11 = scmp.ne.s32.totalorder %s1274_s17, %s1275_s22  ;;  %p1281_p1 = scmp.lt.s32.totalorder %s1279_s21, %s1275_s22 }
  0xbf   : > { %p1277_p12 = pnand %p1276_p11, %p1437_p5  ;;  %p1282_p2 = por %p1281_p1, %p1280_p0 }
  0xc1   : > { %p1278_p13 = pneg %p1277_p12 }
  0xc3   : > { %p1283_p3 = pnand %p1282_p2, %p1278_p13 }
  0xfc   : > { %v479_v24 = vpop.permute.xlu2 %478 }
  0xfd   : > { %v488_v34 = vpack.c.bf16 %v479_v24, %v479_v24 }
 0x112   : > { %v493_v9 = vpop.permute.xlu0 %492  ;;  %v499_v17 = vpop.permute.xlu1 %498 }
 0x113   : > { %v502_v10 = vpack.c.bf16 %v493_v9, %v493_v9  ;;  %v504_v19 = vpack.c.bf16 %v499_v17, %v499_v17 }
 0x115   : > { %v531_v11 = vunpack.c.l.b16 %v502_v10  ;;  %v579_v22 = vunpack.c.l.b16 %v504_v19 }
 0x117   : > { %v532_v12 = vpack.c.b16 %v531_v11, %v531_v11  ;;  %v1469_v23 = vpack.c.b16 %v579_v22, %v579_v22 }
 0x119   : > { %533 = vrot.lane.b32.xlu1 %v532_v12, %s1326_s24 }
 0x11a   : > { %v496_v14 = vpop.permute.xlu0 %495 }
 0x11b   : > { %v503_v15 = vpack.c.bf16 %v496_v14, %v496_v14 }
 0x11d   : > { %v555_v18 = vunpack.c.l.b16 %v503_v15 }
 0x11f   : > { %v1466_v20 = vpack.c.b16 %v555_v18, %v555_v18 }
 0x121   : > { %508 = vrot.lane.b32.xlu1 %v507_v21, %s1326_s24  ;;  %557 = vrot.lane.b32.xlu2 %v1466_v20, %s1326_s24 }
 0x122   : > { %v482_v26 = vpop.permute.xlu0 %481 }
 0x123   : > { %v489_v38 = vpack.c.bf16 %v482_v26, %v482_v26 }
 0x129   : > { %581 = vrot.lane.b32.xlu2 %v1469_v23, %s1326_s24 }
 0x12a   : > { %v485_v29 = vpop.permute.xlu0 %484 }
 0x12b   : > { %v490_v30 = vpack.c.bf16 %v485_v29, %v485_v29 }
 0x17b   : > { %v558_v25 = vpop.permute.xlu2 %557 }
 0x17c   : > { %v563_v33 = vsel %vm510_vm1, %v558_v25, 0 }
 0x183   : > { %v582_v27 = vpop.permute.xlu2 %581 }
 0x184   : > { %v587_v28 = vsel %vm510_vm1, %v582_v27, 0 }
 0x185   : > { %596 = vmatpush.bf16.xpose.msrb.mxu0 %v587_v28 }
 0x18b   : > { %v534_v31 = vpop.permute.xlu1 %533 }
 0x18c   : > { %1118 = vmatmul.msk.bf16.vlgmr.msrb.gmra.mxu0 %vm510_vm1, %v490_v30  ;;  %v539_v32 = vsel %vm510_vm1, %v534_v31, 0 }
 0x18d   : > { %548 = vmatpush.bf16.xpose.msra.mxu3 %v539_v32  ;;  %v739_v32 = vld [vmem:[%s1625_s3] sm:$0xf] }
 0x193   : > { %v509_v35 = vpop.permute.xlu1 %508 }
 0x194   : > { %1116 = vmatmul.msk.bf16.vlgmr.msra.gmra.mxu3 %vm510_vm1, %v488_v34  ;;  %v515_v36 = vsel %vm510_vm1, %v509_v35, 0  ;;  %v740_v34 = vld [vmem:[%s1625_s3 + $0x4] sm:$0xf] }
 0x195   : > { %572 = vmatpush.bf16.xpose.msrb.mxu3 %v563_v33  ;;  %524 = vmatpush.bf16.xpose.msra.mxu1 %v515_v36  ;;  %v747_v33 = vsel %vm655_vm2, %v739_v32, 0  ;;  %v766_v35 = vsel %vm655_vm2, %v740_v34, 0  ;;  %v741_v36 = vld [vmem:[%s1625_s3 + $0x8] sm:$0xf] }
 0x19c   : > { %1115 = vmatmul.msk.bf16.vlgmr.msra.gmra.mxu1 %vm510_vm1, %v487_v37  ;;  %v785_v37 = vsel %vm655_vm2, %v741_v36, 0  ;;  %v1231_v36 = vld [vmem:[%s1627_s5] ss:$0 sm:$0xff] }
 0x1a4   : > { %1117 = vmatmul.msk.bf16.vlgmr.msrb.gmra.mxu3 %vm510_vm1, %v489_v38  ;;  %v742_v38 = vld [vmem:[%s1625_s3 + $0xc] sm:$0xf] }
 0x209   : > { %v598_v39 = vpop.f32.mrf.mxu0 }
 0x20a   : > { %v611_v50 = vsel %vm510_vm1, %v598_v39, -inf }
 0x211   : > { %v600_v40 = vpop.f32.mrf.mxu0 }
 0x217   : > { %v550_v41 = vpop.f32.mrf.mxu3 }
 0x218   : > { %v605_v42 = vsel %vm510_vm1, %v550_v41, -inf }
 0x219   : > { %606 = vmax.xlane.f32.xlu1 %v605_v42  ;;  %v526_v43 = vpop.f32.mrf.mxu1 }
 0x21a   : > { %v602_v44 = vsel %vm510_vm1, %v526_v43, -inf }
 0x21b   : > { %603 = vmax.xlane.f32.xlu0 %v602_v44 }
 0x21f   : > { %v552_v45 = vpop.f32.mrf.mxu3 }
 0x221   : > { %v528_v46 = vpop.f32.mrf.mxu1 }
 0x227   : > { %v574_v47 = vpop.f32.mrf.mxu3 }
 0x228   : > { %v608_v48 = vsel %vm510_vm1, %v574_v47, -inf }
 0x229   : > { %609 = vmax.xlane.f32.xlu2 %v608_v48 }
 0x22f   : > { %v576_v49 = vpop.f32.mrf.mxu3  ;;  %672 = vrot.lane.b32.xlu0 %v532_v12, %s1327_s30 }
 0x231   : > { %612 = vmax.xlane.f32.xlu2 %v611_v50 }
 0x237   : > { %650 = vrot.lane.b32.xlu0 %v507_v21, %s1327_s30 }
 0x28c   : > { %v607_v51 = vpop.xlane.xlu1 %606 }
 0x28d   : > { %v615_v52 = vsub.f32 %v550_v41, %v607_v51 }
 0x28e   : > { %v604_v53 = vpop.xlane.xlu0 %603 }
 0x28f   : > { %v620_v54 = vmul.f32 1.442695, %v615_v52  ;;  %v614_v55 = vsub.f32 %v526_v43, %v604_v53 }
 0x291   : > { %1237 = vpow2.f32 %v620_v54  ;;  %v618_v56 = vmul.f32 1.442695, %v614_v55 }
 0x293   : > { %1239 = vpow2.f32 %v618_v56 }
 0x297   : > { %v1238_v57 = vpop.eup %1237 }
 0x298   : > { %v629_v58 = vsel %vm510_vm1, %v1238_v57, 0.0 }
 0x299   : > { %v1240_v59 = vpop.eup %1239  ;;  %630 = vadd.xlane.f32.xlu1 %v629_v58 }
 0x29a   : > { %v626_v60 = vsel %vm510_vm1, %v1240_v59, 0.0 }
 0x29b   : > { %627 = vadd.xlane.f32.xlu2 %v626_v60 }
 0x29c   : > { %v610_v61 = vpop.xlane.xlu2 %609 }
 0x29d   : > { %v616_v3 = vsub.f32 %v574_v47, %v610_v61 }
 0x29f   : > { %v622_v7 = vmul.f32 1.442695, %v616_v3 }
 0x2a1   : > { %v673_v62 = vpop.permute.xlu0 %672 }
 0x2a2   : > { %v678_v63 = vsel %vm655_vm2, %v673_v62, 0 }
 0x2a3   : > { %687 = vmatpush.bf16.msra.mxu2 %v678_v63 }
 0x2a4   : > { %v613_v0 = vpop.xlane.xlu2 %612 }
 0x2a5   : > { %v617_v1 = vsub.f32 %v598_v39, %v613_v0  ;;  %v804_v39 = vsel %vm655_vm2, %v742_v38, 0  ;;  %v1230_v0 = vld [vmem:[%s1626_s4] ss:$0 sm:$0xff] }
 0x2a6   : > { %v1232_v38 = vld [vmem:[%s1628_s6] ss:$0 sm:$0xff] }
 0x2a7   : > { %v624_v4 = vmul.f32 1.442695, %v617_v1  ;;  %775 = vmatpush.bf16.msrb.mxu2 %v766_v35 }
 0x2a9   : > { %1241 = vpow2.f32 %v624_v4  ;;  %v651_v5 = vpop.permute.xlu0 %650 }
 0x2aa   : > { %v657_v6 = vsel %vm655_vm2, %v651_v5, 0  ;;  %1243 = vpow2.f32 %v622_v7 }
 0x2ab   : > { %666 = vmatpush.bf16.msrb.mxu1 %v657_v6 }
 0x2af   : > { %v1242_v8 = vpop.eup %1241  ;;  %756 = vmatpush.bf16.msra.mxu1 %v747_v33  ;;  %v1178_v33 = vld [vmem:[%s1631_s9 + $0x10] sm:$0xff] }
 0x2b0   : > { %v635_v9 = vsel %vm510_vm1, %v1242_v8, 0.0  ;;  %v1244_v10 = vpop.eup %1243 }
 0x2b1   : > { %636 = vadd.xlane.f32.xlu2 %v635_v9  ;;  %v632_v11 = vsel %vm510_vm1, %v1244_v10, 0.0 }
 0x2b2   : > { %693 = vrot.lane.b32.xlu1 %v1466_v20, %s1327_s30 }
 0x2b9   : > { %633 = vadd.xlane.f32.xlu2 %v632_v11 }
 0x2d1   : > { %714 = vrot.lane.b32.xlu2 %v1469_v23, %s1327_s30 }
 0x30c   : > { %v631_v12 = vpop.xlane.xlu1 %630 }
 0x30d   : > { %1245 = vrcp.f32 %v631_v12 }
 0x30e   : > { %v628_v13 = vpop.xlane.xlu2 %627 }
 0x30f   : > { %1247 = vrcp.f32 %v628_v13 }
 0x313   : > { %v1246_v14 = vpop.eup %1245 }
 0x314   : > { %v643_v15 = vmul.f32 %v1246_v14, %v1238_v57 }
 0x315   : > { %v1248_v16 = vpop.eup %1247 }
 0x316   : > { %v642_v17 = vmul.f32 %v1248_v16, %v1240_v59  ;;  %v647_v18 = vpack.c.bf16 %v643_v15, %v643_v15 }
 0x318   : > { %1120 = vmatmul.msk.bf16.vlgmr.msra.gmra.mxu2 %vm510_vm1, %v647_v18  ;;  %v646_v19 = vpack.c.bf16 %v642_v17, %v642_v17 }
 0x31a   : > { %1119 = vmatmul.msk.bf16.vlgmr.msrb.gmra.mxu1 %vm510_vm1, %v646_v19  ;;  %v1175_v19 = vld [vmem:[%s1629_s7 + $0x8] sm:$0xff] }
 0x31b   : > { %901 = vmatpush.bf16.msrb.mxu1 %v1175_v19 }
 0x324   : > { %v694_v20 = vpop.permute.xlu1 %693  ;;  %v637_v21 = vpop.xlane.xlu2 %636 }
 0x325   : > { %v699_v22 = vsel %vm655_vm2, %v694_v20, 0  ;;  %1249 = vrcp.f32 %v637_v21  ;;  %v1174_v20 = vld [vmem:[%s1629_s7] sm:$0xff]  ;;  %v1183_v21 = vld [vmem:[%s1631_s9 + $0x38] sm:$0xff] }
 0x326   : > { %708 = vmatpush.bf16.msra.mxu3 %v699_v22  ;;  %902 = vmatpush.bf16.msrb.mxu1 %v1174_v20 }
 0x327   : > { %978 = vmatpush.bf16.msra.mxu2 %v1183_v21 }
 0x32a   : > { %794 = vmatpush.bf16.msrb.mxu3 %v785_v37 }
 0x32b   : > { %v1250_v24 = vpop.eup %1249 }
 0x32c   : > { %v634_v23 = vpop.xlane.xlu2 %633  ;;  %v645_v26 = vmul.f32 %v1250_v24, %v1242_v8  ;;  %v1328_v8 = vmov 32.0   ;;  %v1182_v24 = vld [vmem:[%s1631_s9 + $0x30] sm:$0xff] }
 0x32d   : > { %1251 = vrcp.f32 %v634_v23  ;;  %979 = vmatpush.bf16.msra.mxu2 %v1182_v24 }
 0x32e   : > { %v649_v31 = vpack.c.bf16 %v645_v26, %v645_v26  ;;  %1253 = vrcp.f32 %v1328_v8  ;;  %v1181_v26 = vld [vmem:[%s1631_s9 + $0x28] sm:$0xff]  ;;  %v1235_v8 = vld [vmem:[%s1633_s11] ss:$0 sm:$0xff] }
 0x331   : > { %980 = vmatpush.bf16.msra.mxu2 %v1181_v26 }
 0x333   : > { %v1252_v25 = vpop.eup %1251 }
 0x334   : > { %v644_v27 = vmul.f32 %v1252_v25, %v1244_v10  ;;  %v715_v28 = vpop.permute.xlu2 %714  ;;  %v1254_v9 = vpop.eup %1253 }
 0x335   : > { %v720_v29 = vsel %vm655_vm2, %v715_v28, 0  ;;  %v836_v10 = vmul.f32 32.0, %v1254_v9  ;;  %vm840_vm3 = vweird.f32 %v1254_v9 }
 0x336   : > { %v648_v30 = vpack.c.bf16 %v644_v27, %v644_v27  ;;  %729 = vmatpush.bf16.msra.mxu0 %v720_v29  ;;  %v1180_v27 = vld [vmem:[%s1631_s9 + $0x20] sm:$0xff] }
 0x337   : > { %v837_v11 = vsub.f32 1.0, %v836_v10  ;;  %981 = vmatpush.bf16.msra.mxu2 %v1180_v27 }
 0x338   : > { %1121 = vmatmul.msk.bf16.vlgmr.msra.gmra.mxu3 %vm510_vm1, %v648_v30  ;;  %v1179_v30 = vld [vmem:[%s1631_s9 + $0x18] sm:$0xff] }
 0x339   : > { %1122 = vmatmul.msk.bf16.vlgmr.msra.gmra.mxu0 %vm510_vm1, %v649_v31  ;;  %v838_v12 = vmul.f32 %v1254_v9, %v837_v11  ;;  %v1236_v11 = vld [vmem:[%s1634_s12] ss:$0 sm:$0xff] }
 0x33a   : > { %813 = vmatpush.bf16.msrb.mxu0 %v804_v39 }
 0x33b   : > { %v839_v13 = vadd.f32 %v1254_v9, %v838_v12  ;;  %982 = vmatpush.bf16.msra.mxu2 %v1179_v30 }
 0x33d   : > { %v1531_v14 = vsel %vm840_vm3, %v1254_v9, %v839_v13 }
 0x33f   : > { %983 = vmatpush.bf16.msra.mxu2 %v1178_v33 }
 0x397   : > { %v668_v40 = vpop.f32.mrf.mxu1 }
 0x398   : > { %v735_v41 = vpack.c.bf16 %v668_v40, %v668_v40 }
 0x39a   : > { %1123 = vmatmul.msk.bf16.vlgmr.msra.gmra.mxu1 %vm510_vm1, %v735_v41 }
 0x39b   : > { %v689_v42 = vpop.f32.mrf.mxu2 }
 0x39c   : > { %v736_v43 = vpack.c.bf16 %v689_v42, %v689_v42 }
 0x39e   : > { %1124 = vmatmul.msk.bf16.vlgmr.msrb.gmra.mxu2 %vm510_vm1, %v736_v43  ;;  %v1177_v43 = vld [vmem:[%s1631_s9 + $0x8] sm:$0xff] }
 0x39f   : > { %v670_v44 = vpop.f32.mrf.mxu1  ;;  %984 = vmatpush.bf16.msra.mxu2 %v1177_v43 }
 0x3a0   : > { %v1176_v44 = vld [vmem:[%s1631_s9] sm:$0xff] }
 0x3a3   : > { %v691_v45 = vpop.f32.mrf.mxu2  ;;  %985 = vmatpush.bf16.msra.mxu2 %v1176_v44 }
 0x3a4   : > { %v1233_v45 = vld [vmem:[%s1630_s8] ss:$0 sm:$0xff] }
 0x3b6   : > { %v731_v46 = vpop.f32.mrf.mxu0 }
 0x3b7   : > { %v738_v47 = vpack.c.bf16 %v731_v46, %v731_v46 }
 0x3b9   : > { %1126 = vmatmul.msk.bf16.vlgmr.msrb.gmra.mxu0 %vm510_vm1, %v738_v47 }
 0x3bb   : > { %v710_v48 = vpop.f32.mrf.mxu3 }
 0x3bc   : > { %v737_v49 = vpack.c.bf16 %v710_v48, %v710_v48 }
 0x3be   : > { %v733_v50 = vpop.f32.mrf.mxu0  ;;  %1125 = vmatmul.msk.bf16.vlgmr.msrb.gmra.mxu3 %vm510_vm1, %v737_v49 }
 0x3c3   : > { %v712_v51 = vpop.f32.mrf.mxu3 }
 0x3c4   : > { %v1234_v51 = vld [vmem:[%s1632_s10] ss:$0 sm:$0xff] }
 0x417   : > { %v758_v52 = vpop.f32.mrf.mxu1 }
 0x418   : > { %v819_v59 = vsel %vm459_vm0, %v758_v52, 0.0 }
 0x41f   : > { %v760_v53 = vpop.f32.mrf.mxu1 }
 0x421   : > { %v777_v54 = vpop.f32.mrf.mxu2 }
 0x422   : > { %v820_v57 = vsel %vm459_vm0, %v777_v54, 0.0 }
 0x423   : > { %v821_v60 = vadd.f32 %v820_v57, %v819_v59 }
 0x429   : > { %v779_v55 = vpop.f32.mrf.mxu2 }
 0x436   : > { %v815_v56 = vpop.f32.mrf.mxu0 }
 0x437   : > { %v824_v1 = vsel %vm459_vm0, %v815_v56, 0.0 }
 0x43e   : > { %v817_v58 = vpop.f32.mrf.mxu0 }
 0x441   : > { %v796_v61 = vpop.f32.mrf.mxu3 }
 0x442   : > { %v822_v62 = vsel %vm459_vm0, %v796_v61, 0.0 }
 0x443   : > { %v823_v63 = vadd.f32 %v822_v62, %v821_v60 }
 0x445   : > { %v825_v3 = vadd.f32 %v824_v1, %v823_v63 }
 0x447   : > { %v830_v4 = vadd.f32 %v1230_v0, %v825_v3 }
 0x449   : > { %v798_v5 = vpop.f32.mrf.mxu3  ;;  %v831_v6 = vadd.f32 %v830_v4, %v1458_v2 }
 0x44b   : > { %v832_v7 = vsel %vm459_vm0, %v831_v6, 0.0 }
 0x44c   : > { %833 = vadd.xlane.f32.xlu1 %v832_v7 }
 0x4bf   : > { %v834_v15 = vpop.xlane.xlu1 %833 }
 0x4c0   : > { %v842_v16 = vmul.f32 %v1531_v14, %v834_v15 }
 0x4c2   : > { %v843_v17 = vsub.f32 %v831_v6, %v842_v16 }
 0x4c4   : > { %v844_v18 = vmul.f32 %v843_v17, %v843_v17 }
 0x4c6   : > { %v845_v2 = vsel %vm459_vm0, %v844_v18, 0.0 }
 0x4c7   : > { %846 = vadd.xlane.f32.xlu0 %v845_v2 }
 0x53a   : > { %v847_v22 = vpop.xlane.xlu0 %846 }
 0x53b   : > { %v848_v23 = vmul.f32 %v847_v22, %v1531_v14 }
 0x53d   : > { %v849_v25 = vadd.f32 1e-05, %v848_v23 }
 0x53f   : > { %1255 = vrsqrt.f32 %v849_v25  ;;  %vm856_vm5 = vweird.f32 %v849_v25 }
 0x545   : > { %v1256_v28 = vpop.eup %1255 }
 0x546   : > { %v851_v29 = vmul.f32 %v1256_v28, %v849_v25  ;;  %vm857_vm4 = vweird.f32 %v1256_v28 }
 0x547   : > { %vm858_vm6 = vmor %vm856_vm5, %vm857_vm4 }
 0x548   : > { %v852_v31 = vmul.f32 %v1256_v28, %v851_v29 }
 0x54a   : > { %v853_v32 = vmul.f32 0.5, %v852_v31 }
 0x54c   : > { %v854_v34 = vsub.f32 1.5, %v853_v32 }
 0x54e   : > { %v855_v35 = vmul.f32 %v1256_v28, %v854_v34 }
 0x550   : > { %v859_v37 = vsel %vm858_vm6, %v1256_v28, %v855_v35 }
 0x551   : > { %v860_v39 = vmul.f32 %v859_v37, %v843_v17 }
 0x553   : > { %v865_v40 = vmul.f32 %v1231_v36, %v860_v39 }
 0x555   : > { %v870_v41 = vadd.f32 %v1232_v38, %v865_v40 }
 0x557   : > { %v871_v42 = vpack.c.bf16 %v870_v41, %v870_v41 }
 0x559   : > { %1135 = vmatmul.msk.bf16.vlgmr.msrb.gmra.mxu1 %vm459_vm0, %v871_v42 }
 0x5d6   : > { %v904_v46 = vpop.f32.mrf.mxu1 }
 0x5d7   : > { %v905_v47 = vadd.f32 %v1233_v45, %v904_v46 }
 0x5d9   : > { %v908_v48 = vmax.f32 %v905_v47, 0.0 }
 0x5db   : > { %v909_v49 = vpack.c.bf16 %v908_v48, %v908_v48 }
 0x5dd   : > { %986 = vmatmul.bf16.vlgmr.msra.gmra.mxu2 %v909_v49 }
 0x5de   : > { %v906_v50 = vpop.f32.mrf.mxu1 }
 0x660   : > { %v987_v52 = vpop.f32.mrf.mxu2 }
 0x661   : > { %v988_v53 = vadd.f32 %v1234_v51, %v987_v52 }
 0x663   : > { %v991_v54 = vadd.f32 %v988_v53, %v870_v41 }
 0x665   : > { %v992_v55 = vsel %vm459_vm0, %v991_v54, 0.0 }
 0x666   : > { %993 = vadd.xlane.f32.xlu2 %v992_v55 }
 0x668   : > { %v989_v56 = vpop.f32.mrf.mxu2 }
 0x6d9   : > { %v994_v57 = vpop.xlane.xlu2 %993 }
 0x6da   : > { %v995_v58 = vmul.f32 %v994_v57, %v1531_v14 }
 0x6dc   : > { %v996_v59 = vsub.f32 %v991_v54, %v995_v58 }
 0x6de   : > { %v997_v60 = vmul.f32 %v996_v59, %v996_v59 }
 0x6e0   : > { %v998_v61 = vsel %vm459_vm0, %v997_v60, 0.0 }
 0x6e1   : > { %999 = vadd.xlane.f32.xlu1 %v998_v61 }
 0x754   : > { %v1000_v62 = vpop.xlane.xlu1 %999 }
 0x755   : > { %v1001_v63 = vmul.f32 %v1000_v62, %v1531_v14 }
 0x757   : > { %v1002_v0 = vadd.f32 1e-05, %v1001_v63 }
 0x759   : > { %1257 = vrsqrt.f32 %v1002_v0  ;;  %vm1009_vm8 = vweird.f32 %v1002_v0 }
 0x75f   : > { %v1258_v1 = vpop.eup %1257 }
 0x760   : > { %v1004_v3 = vmul.f32 %v1258_v1, %v1002_v0  ;;  %vm1010_vm7 = vweird.f32 %v1258_v1 }
 0x761   : > { %vm1011_vm9 = vmor %vm1009_vm8, %vm1010_vm7 }
 0x762   : > { %v1005_v4 = vmul.f32 %v1258_v1, %v1004_v3 }
 0x764   : > { %v1006_v5 = vmul.f32 0.5, %v1005_v4 }
 0x766   : > { %v1007_v6 = vsub.f32 1.5, %v1006_v5 }
 0x768   : > { %v1008_v7 = vmul.f32 %v1258_v1, %v1007_v6 }
 0x76a   : > { %v1012_v9 = vsel %vm1011_vm9, %v1258_v1, %v1008_v7 }
 0x76b   : > { %v1013_v10 = vmul.f32 %v1012_v9, %v996_v59 }
 0x76d   : > { %v1018_v12 = vmul.f32 %v1235_v8, %v1013_v10 }
 0x76f   : > { %v1023_v13 = vadd.f32 %v1236_v11, %v1018_v12 }
 0x771   : > { %1024 = vst.msk [vmem:[%s431_s1] sm:$0xff] %vm459_vm0, %v1023_v13 }
 0x772   : > { %1286 = shalt.err (!%p1283_p3)
}
 0x773   : > { %1184 = dma.vmem_to_hbm [thread:$0]  (%p1437_p5), %s1039_s29, 128, %s1041_s2, %s1026_s23  }
 0x774 PF: > { %p1190_p4 = scmp.ge.s32.totalorder %s1321_s28, 2  ;;  %s1052_s1 = sand.u32 1, %s1309_s25  }
 0x775   : > { %s1053_s20 = scalar_lea.sflag [#allocation3], %s1052_s1 }
 0x776   : > { %p1187_p7 = pnand %p1190_p4, %p1441_p6 }
 0x778   : > { %p1188_p8 = pneg %p1187_p7 }
 0x77a   : > { %1304 = dma.done.wait (%p1188_p8), %s1053_s20, 128  }
 0x77b   : > { %1306 = vsyncadd (%p1188_p8), %s1053_s20, 4294967168  ;;  %s1645_s16 = sld [smem:[#allocation5_spill]]  ;;  %p23_p9 = scmp.ge.s32.totalorder %s1424_s14, 4  }
 0x77c   : > { %s1646_s25 = smov %s1313_s26  ;;  %s1647_s26 = smov %s1317_s27 }
 0x77d   : > { %s1649_s28 = smov %s1424_s14  ;;  %25 = sbr.rel (!%p23_p9) target bundleno = 7 (0x7), region = 107 }
 0x781   : > { %s1648_s27 = smov %s1645_s16 }
 0x782   :  { %1059 = vsyncpa [#allocation3], 1 }
 0x783   :  { %1061 = vsyncpa [#allocation3 + $0x1], 1 }

// kernel: tpu_custom_call.1
= control target key start
LH: loop header
LB: loop body
LE: loop exit
PB: predicated region body
PF: predicated region fallthrough
CT: control target
= control target key end

     0   :  { %s1622_s0 = inlined_call_operand.vmem [shape: f32[2,8,32], index: 0, kind: input, shape index: {}]   ;;  %s1623_s1 = inlined_call_operand.vmem [shape: bf16[32,96], index: 1, kind: input, shape index: {}]   ;;  %s1624_s2 = inlined_call_operand.vmem [shape: f32[1,96], index: 2, kind: input, shape index: {}]   ;;  %s1625_s3 = inlined_call_operand.vmem [shape: bf16[4,8,32], index: 3, kind: input, shape index: {}]   ;;  %s1626_s4 = inlined_call_operand.vmem [shape: f32[1,32], index: 4, kind: input, shape index: {}]   ;;  %s1627_s5 = inlined_call_operand.vmem [shape: f32[1,32], index: 5, kind: input, shape index: {}]   ;;  %s1628_s6 = inlined_call_operand.vmem [shape: f32[1,32], index: 6, kind: input, shape index: {}]   ;;  %s1629_s7 = inlined_call_operand.vmem [shape: bf16[32,128], index: 7, kind: input, shape index: {}]   ;;  %s1630_s8 = inlined_call_operand.vmem [shape: f32[1,128], index: 8, kind: input, shape index: {}]   ;;  %s1631_s9 = inlined_call_operand.vmem [shape: bf16[128,32], index: 9, kind: input, shape index: {}]   ;;  %s1632_s10 = inlined_call_operand.vmem [shape: f32[1,32], index: 10, kind: input, shape index: {}]   ;;  %s1633_s11 = inlined_call_operand.vmem [shape: f32[1,32], index: 11, kind: input, shape index: {}]   ;;  %s1634_s12 = inlined_call_operand.vmem [shape: f32[1,32], index: 12, kind: input, shape index: {}]   ;;  %s1635_s13 = inlined_call_operand.hbm [shape: f32[2,8,32], index: 13, kind: output, shape index: {}]  }
   0x1   :  { %1636 = sst [smem:[#allocation6_spill]] %s1622_s0 }
   0x2   :  { %1637 = sst [smem:[#allocation7_spill]] %s1623_s1 }
   0x3   :  { %1638 = sst [smem:[#allocation8_spill]] %s1624_s2 }
   0x4   :  { %18 = vsyncpa [#allocation3], 0 }
   0x5   :  { %20 = vsyncpa [#allocation3 + $0x1], 0  ;;  %s1399_s25 = smov 0   ;;  %s1401_s26 = smov 0  }
   0x6   :  { %s1403_s27 = smov 0   ;;  %s1405_s28 = smov 0  }
   0x7 LB: > { %s1420_s29 = sadd.s32 4294967295, %s1321_s28   ;;  %s1100_s30 = sadd.s32 4294967294, %s1321_s28   ;;  %s1321_s28 = sphi %s1405_s28, %s1649_s28   ;;  %s1317_s27 = sphi %s1403_s27, %s1648_s27   ;;  %s1313_s26 = sphi %s1401_s26, %s1647_s26   ;;  %s1309_s25 = sphi %s1399_s25, %s1646_s25  }
   0x8   : > { %s1424_s14 = sadd.s32 1, %s1321_s28   ;;  %s311_s15 = sadd.s32 1, %s1317_s27 }
   0x9   : > { %s308_s16 = ssub.s32 %s1321_s28, %s1424_s14  ;;  %p321_p0 = scmp.ne.s32.totalorder %s1317_s27, %s1313_s26 }
   0xa   : > { %p309_p1 = scmp.eq.s32.totalorder %s308_s16, 0  ;;  %p322_p2 = scmp.eq.s32.totalorder %s1420_s29, 1 }
   0xb   : > { %p327_p3 = scmp.ne.s32.totalorder %s1313_s26, %s1309_s25  ;;  %p328_p4 = scmp.eq.s32.totalorder %s1100_s30, 1 }
   0xc   : > { %s1435_s17 = scalar_select %p309_p1, %s1317_s27, %s311_s15  }
   0xd   : > { %p1437_p5 = por %p322_p2, %p321_p0  ;;  %p1441_p6 = por %p328_p4, %p327_p3 }
   0xe   : > { %1639 = sst [smem:[#allocation5_spill]] %s1435_s17  ;;  %p1103_p7 = scmp.ge.s32.totalorder %s1321_s28, 1 }
   0xf   : > { %p389_p8 = scmp.lt.s32.totalorder %s1321_s28, 3 }
  0x11   : > { %p390_p9 = pnand %p1103_p7, %p389_p8 }
  0x12   : > { %s1642_s1 = sld [smem:[#allocation7_spill]] (!%p390_p9)  ;;  %p432_p10 = scmp.lt.s32.totalorder (!%p390_p9), %s1420_s29, 1 }
  0x13   : > { %393 = sbr.rel (%p390_p9) target bundleno = 1908 (0x774), region = 72  ;;  %s1643_s0 = sld [smem:[#allocation6_spill]] (!%p390_p9) }
  0x14   : > { %s1644_s2 = sld [smem:[#allocation8_spill]] (!%p390_p9)  ;;  %s1323_s22 = smov (!%p390_p9), 104  }
  0x15   : > { %s1324_s23 = smov (!%p390_p9), 120   ;;  %s429_s20 = sand.u32 (!%p390_p9), 1, %s1313_s26  }
  0x16   : > { %s1104_s21 = sshll.u32 (!%p390_p9), %s429_s20, 3 }
  0x18   : > { %v1173_v0 = vld [vmem:[%s1642_s1 + $0x8] sm:$0xff]  ;;  %v1172_v1 = vld [vmem:[%s1642_s1] sm:$0xff]  ;;  %s433_s24 = scalar_select %p432_p10, %s1420_s29, 1  ;;  %vm459_vm0 = vcmask 261120   ;;  %vm510_vm1 = vcmask 64512   ;;  %vm655_vm2 = vcmask 1043456  }
  0x19   : > { %469 = vmatpush.bf16.msra.mxu0 %v1173_v0  ;;  %s431_s1 = scalar_lea.vmem [#allocation2], %s1104_s21  ;;  %s1279_s21 = scalar_lea.hbm %s1635_s13, 16 }
  0x1a   : > { %s1105_s30 = sshll.u32 %s433_s24, 3  ;;  %v1229_v4 = vld [vmem:[%s1644_s2] ss:$0 sm:$0xff]  ;;  %s1326_s24 = smov 96  }
  0x1b   : > { %s435_s17 = scalar_lea.vmem %s1643_s0, %s1105_s30  ;;  %s1327_s30 = smov 64  }
  0x1c   : > { %v1458_v2 = vld [vmem:[%s435_s17] sm:$0xff]  ;;  %s1325_s17 = smov 112  }
  0x1d   : > { %470 = vmatpush.bf16.msra.mxu0 %v1172_v1  ;;  %v438_v3 = vpack.c.bf16 %v1458_v2, %v1458_v2 }
  0x20   : > { %1114 = vmatmul.msk.bf16.vlgmr.msra.gmra.mxu0 %vm459_vm0, %v438_v3 }
  0x9d   : > { %v472_v5 = vpop.f32.mrf.mxu0 }
  0x9e   : > { %v473_v6 = vadd.f32 %v1229_v4, %v472_v5 }
  0xa0   : > { %498 = vrot.lane.b32.xlu1 %v473_v6, %s1323_s22  ;;  %492 = vrot.lane.b32.xlu0 %v473_v6, %s1324_s23  ;;  %v476_v7 = vmul.f32 0.35355338, %v473_v6  ;;  %v501_v13 = vpack.c.bf16 %v473_v6, %v473_v6 }
  0xa2   : > { %478 = vrot.lane.b32.xlu2 %v476_v7, %s1324_s23  ;;  %v506_v16 = vunpack.c.l.b16 %v501_v13  ;;  %v487_v37 = vpack.c.bf16 %v476_v7, %v476_v7  ;;  %s1026_s23 = scalar_lea.sflag [#allocation3], %s429_s20 }
  0xa4   : > { %v507_v21 = vpack.c.b16 %v506_v16, %v506_v16 }
  0xa5   : > { %v474_v8 = vpop.f32.mrf.mxu0 }
  0xa8   : > { %495 = vrot.lane.b32.xlu0 %v473_v6, %s1325_s17 }
  0xb0   : > { %481 = vrot.lane.b32.xlu0 %v476_v7, %s1325_s17 }
  0xb8   : > { %484 = vrot.lane.b32.xlu0 %v476_v7, %s1323_s22  ;;  %s1169_s22 = sshll.u32 %s1420_s29, 3  ;;  %s1038_s29 = sshll.u32 %s431_s1, 4  ;;  %s1039_s29 = int_to_ptr.vmem [resolvable:$true] %s1038_s29 }
  0xb9   : > { %s1036_s15 = scalar_lea.hbm %s1635_s13, %s1169_s22 }
  0xba   : > { %s1040_s2 = sshll.u32 %s1036_s15, 4  ;;  %s1041_s2 = int_to_ptr.hbm [resolvable:$true] %s1040_s2 }
  0xbb   : > { %s1273_s17 = sshra.s32 %s1041_s2, 4  ;;  %s1274_s17 = int_to_ptr.hbm [resolvable:$true] %s1273_s17 }
  0xbc   : > { %s1275_s22 = scalar_lea.hbm %s1274_s17, 8  ;;  %p1280_p0 = scmp.lt.s32.totalorder %s1274_s17, %s1635_s13 }
  0xbd   : > { %p1276_p11 = scmp.ne.s32.totalorder %s1274_s17, %s1275_s22  ;;  %p1281_p1 = scmp.lt.s32.totalorder %s1279_s21, %s1275_s22 }
  0xbf   : > { %p1277_p12 = pnand %p1276_p11, %p1437_p5  ;;  %p1282_p2 = por %p1281_p1, %p1280_p0 }
  0xc1   : > { %p1278_p13 = pneg %p1277_p12 }
  0xc3   : > { %p1283_p3 = pnand %p1282_p2, %p1278_p13 }
  0xfc   : > { %v479_v24 = vpop.permute.xlu2 %478 }
  0xfd   : > { %v488_v34 = vpack.c.bf16 %v479_v24, %v479_v24 }
 0x112   : > { %v493_v9 = vpop.permute.xlu0 %492  ;;  %v499_v17 = vpop.permute.xlu1 %498 }
 0x113   : > { %v502_v10 = vpack.c.bf16 %v493_v9, %v493_v9  ;;  %v504_v19 = vpack.c.bf16 %v499_v17, %v499_v17 }
 0x115   : > { %v531_v11 = vunpack.c.l.b16 %v502_v10  ;;  %v579_v22 = vunpack.c.l.b16 %v504_v19 }
 0x117   : > { %v532_v12 = vpack.c.b16 %v531_v11, %v531_v11  ;;  %v1469_v23 = vpack.c.b16 %v579_v22, %v579_v22 }
 0x119   : > { %533 = vrot.lane.b32.xlu1 %v532_v12, %s1326_s24 }
 0x11a   : > { %v496_v14 = vpop.permute.xlu0 %495 }
 0x11b   : > { %v503_v15 = vpack.c.bf16 %v496_v14, %v496_v14 }
 0x11d   : > { %v555_v18 = vunpack.c.l.b16 %v503_v15 }
 0x11f   : > { %v1466_v20 = vpack.c.b16 %v555_v18, %v555_v18 }
 0x121   : > { %508 = vrot.lane.b32.xlu1 %v507_v21, %s1326_s24  ;;  %557 = vrot.lane.b32.xlu2 %v1466_v20, %s1326_s24 }
 0x122   : > { %v482_v26 = vpop.permute.xlu0 %481 }
 0x123   : > { %v489_v38 = vpack.c.bf16 %v482_v26, %v482_v26 }
 0x129   : > { %581 = vrot.lane.b32.xlu2 %v1469_v23, %s1326_s24 }
 0x12a   : > { %v485_v29 = vpop.permute.xlu0 %484 }
 0x12b   : > { %v490_v30 = vpack.c.bf16 %v485_v29, %v485_v29 }
 0x17b   : > { %v558_v25 = vpop.permute.xlu2 %557 }
 0x17c   : > { %v563_v33 = vsel %vm510_vm1, %v558_v25, 0 }
 0x183   : > { %v582_v27 = vpop.permute.xlu2 %581 }
 0x184   : > { %v587_v28 = vsel %vm510_vm1, %v582_v27, 0 }
 0x185   : > { %596 = vmatpush.bf16.xpose.msrb.mxu0 %v587_v28 }
 0x18b   : > { %v534_v31 = vpop.permute.xlu1 %533 }
 0x18c   : > { %1118 = vmatmul.msk.bf16.vlgmr.msrb.gmra.mxu0 %vm510_vm1, %v490_v30  ;;  %v539_v32 = vsel %vm510_vm1, %v534_v31, 0 }
 0x18d   : > { %548 = vmatpush.bf16.xpose.msra.mxu3 %v539_v32  ;;  %v739_v32 = vld [vmem:[%s1625_s3] sm:$0xf] }
 0x193   : > { %v509_v35 = vpop.permute.xlu1 %508 }
 0x194   : > { %1116 = vmatmul.msk.bf16.vlgmr.msra.gmra.mxu3 %vm510_vm1, %v488_v34  ;;  %v515_v36 = vsel %vm510_vm1, %v509_v35, 0  ;;  %v740_v34 = vld [vmem:[%s1625_s3 + $0x4] sm:$0xf] }
 0x195   : > { %572 = vmatpush.bf16.xpose.msrb.mxu3 %v563_v33  ;;  %524 = vmatpush.bf16.xpose.msra.mxu1 %v515_v36  ;;  %v747_v33 = vsel %vm655_vm2, %v739_v32, 0  ;;  %v766_v35 = vsel %vm655_vm2, %v740_v34, 0  ;;  %v741_v36 = vld [vmem:[%s1625_s3 + $0x8] sm:$0xf] }
 0x19c   : > { %1115 = vmatmul.msk.bf16.vlgmr.msra.gmra.mxu1 %vm510_vm1, %v487_v37  ;;  %v785_v37 = vsel %vm655_vm2, %v741_v36, 0  ;;  %v1231_v36 = vld [vmem:[%s1627_s5] ss:$0 sm:$0xff] }
 0x1a4   : > { %1117 = vmatmul.msk.bf16.vlgmr.msrb.gmra.mxu3 %vm510_vm1, %v489_v38  ;;  %v742_v38 = vld [vmem:[%s1625_s3 + $0xc] sm:$0xf] }
 0x209   : > { %v598_v39 = vpop.f32.mrf.mxu0 }
 0x20a   : > { %v611_v50 = vsel %vm510_vm1, %v598_v39, -inf }
 0x211   : > { %v600_v40 = vpop.f32.mrf.mxu0 }
 0x217   : > { %v550_v41 = vpop.f32.mrf.mxu3 }
 0x218   : > { %v605_v42 = vsel %vm510_vm1, %v550_v41, -inf }
 0x219   : > { %606 = vmax.xlane.f32.xlu1 %v605_v42  ;;  %v526_v43 = vpop.f32.mrf.mxu1 }
 0x21a   : > { %v602_v44 = vsel %vm510_vm1, %v526_v43, -inf }
 0x21b   : > { %603 = vmax.xlane.f32.xlu0 %v602_v44 }
 0x21f   : > { %v552_v45 = vpop.f32.mrf.mxu3 }
 0x221   : > { %v528_v46 = vpop.f32.mrf.mxu1 }
 0x227   : > { %v574_v47 = vpop.f32.mrf.mxu3 }
 0x228   : > { %v608_v48 = vsel %vm510_vm1, %v574_v47, -inf }
 0x229   : > { %609 = vmax.xlane.f32.xlu2 %v608_v48 }
 0x22f   : > { %v576_v49 = vpop.f32.mrf.mxu3  ;;  %672 = vrot.lane.b32.xlu0 %v532_v12, %s1327_s30 }
 0x231   : > { %612 = vmax.xlane.f32.xlu2 %v611_v50 }
 0x237   : > { %650 = vrot.lane.b32.xlu0 %v507_v21, %s1327_s30 }
 0x28c   : > { %v607_v51 = vpop.xlane.xlu1 %606 }
 0x28d   : > { %v615_v52 = vsub.f32 %v550_v41, %v607_v51 }
 0x28e   : > { %v604_v53 = vpop.xlane.xlu0 %603 }
 0x28f   : > { %v620_v54 = vmul.f32 1.442695, %v615_v52  ;;  %v614_v55 = vsub.f32 %v526_v43, %v604_v53 }
 0x291   : > { %1237 = vpow2.f32 %v620_v54  ;;  %v618_v56 = vmul.f32 1.442695, %v614_v55 }
 0x293   : > { %1239 = vpow2.f32 %v618_v56 }
 0x297   : > { %v1238_v57 = vpop.eup %1237 }
 0x298   : > { %v629_v58 = vsel %vm510_vm1, %v1238_v57, 0.0 }
 0x299   : > { %v1240_v59 = vpop.eup %1239  ;;  %630 = vadd.xlane.f32.xlu1 %v629_v58 }
 0x29a   : > { %v626_v60 = vsel %vm510_vm1, %v1240_v59, 0.0 }
 0x29b   : > { %627 = vadd.xlane.f32.xlu2 %v626_v60 }
 0x29c   : > { %v610_v61 = vpop.xlane.xlu2 %609 }
 0x29d   : > { %v616_v3 = vsub.f32 %v574_v47, %v610_v61 }
 0x29f   : > { %v622_v7 = vmul.f32 1.442695, %v616_v3 }
 0x2a1   : > { %v673_v62 = vpop.permute.xlu0 %672 }
 0x2a2   : > { %v678_v63 = vsel %vm655_vm2, %v673_v62, 0 }
 0x2a3   : > { %687 = vmatpush.bf16.msra.mxu2 %v678_v63 }
 0x2a4   : > { %v613_v0 = vpop.xlane.xlu2 %612 }
 0x2a5   : > { %v617_v1 = vsub.f32 %v598_v39, %v613_v0  ;;  %v804_v39 = vsel %vm655_vm2, %v742_v38, 0  ;;  %v1230_v0 = vld [vmem:[%s1626_s4] ss:$0 sm:$0xff] }
 0x2a6   : > { %v1232_v38 = vld [vmem:[%s1628_s6] ss:$0 sm:$0xff] }
 0x2a7   : > { %v624_v4 = vmul.f32 1.442695, %v617_v1  ;;  %775 = vmatpush.bf16.msrb.mxu2 %v766_v35 }
 0x2a9   : > { %1241 = vpow2.f32 %v624_v4  ;;  %v651_v5 = vpop.permute.xlu0 %650 }
 0x2aa   : > { %v657_v6 = vsel %vm655_vm2, %v651_v5, 0  ;;  %1243 = vpow2.f32 %v622_v7 }
 0x2ab   : > { %666 = vmatpush.bf16.msrb.mxu1 %v657_v6 }
 0x2af   : > { %v1242_v8 = vpop.eup %1241  ;;  %756 = vmatpush.bf16.msra.mxu1 %v747_v33  ;;  %v1178_v33 = vld [vmem:[%s1631_s9 + $0x10] sm:$0xff] }
 0x2b0   : > { %v635_v9 = vsel %vm510_vm1, %v1242_v8, 0.0  ;;  %v1244_v10 = vpop.eup %1243 }
 0x2b1   : > { %636 = vadd.xlane.f32.xlu2 %v635_v9  ;;  %v632_v11 = vsel %vm510_vm1, %v1244_v10, 0.0 }
 0x2b2   : > { %693 = vrot.lane.b32.xlu1 %v1466_v20, %s1327_s30 }
 0x2b9   : > { %633 = vadd.xlane.f32.xlu2 %v632_v11 }
 0x2d1   : > { %714 = vrot.lane.b32.xlu2 %v1469_v23, %s1327_s30 }
 0x30c   : > { %v631_v12 = vpop.xlane.xlu1 %630 }
 0x30d   : > { %1245 = vrcp.f32 %v631_v12 }
 0x30e   : > { %v628_v13 = vpop.xlane.xlu2 %627 }
 0x30f   : > { %1247 = vrcp.f32 %v628_v13 }
 0x313   : > { %v1246_v14 = vpop.eup %1245 }
 0x314   : > { %v643_v15 = vmul.f32 %v1246_v14, %v1238_v57 }
 0x315   : > { %v1248_v16 = vpop.eup %1247 }
 0x316   : > { %v642_v17 = vmul.f32 %v1248_v16, %v1240_v59  ;;  %v647_v18 = vpack.c.bf16 %v643_v15, %v643_v15 }
 0x318   : > { %1120 = vmatmul.msk.bf16.vlgmr.msra.gmra.mxu2 %vm510_vm1, %v647_v18  ;;  %v646_v19 = vpack.c.bf16 %v642_v17, %v642_v17 }
 0x31a   : > { %1119 = vmatmul.msk.bf16.vlgmr.msrb.gmra.mxu1 %vm510_vm1, %v646_v19  ;;  %v1175_v19 = vld [vmem:[%s1629_s7 + $0x8] sm:$0xff] }
 0x31b   : > { %901 = vmatpush.bf16.msrb.mxu1 %v1175_v19 }
 0x324   : > { %v694_v20 = vpop.permute.xlu1 %693  ;;  %v637_v21 = vpop.xlane.xlu2 %636 }
 0x325   : > { %v699_v22 = vsel %vm655_vm2, %v694_v20, 0  ;;  %1249 = vrcp.f32 %v637_v21  ;;  %v1174_v20 = vld [vmem:[%s1629_s7] sm:$0xff]  ;;  %v1183_v21 = vld [vmem:[%s1631_s9 + $0x38] sm:$0xff] }
 0x326   : > { %708 = vmatpush.bf16.msra.mxu3 %v699_v22  ;;  %902 = vmatpush.bf16.msrb.mxu1 %v1174_v20 }
 0x327   : > { %978 = vmatpush.bf16.msra.mxu2 %v1183_v21 }
 0x32a   : > { %794 = vmatpush.bf16.msrb.mxu3 %v785_v37 }
 0x32b   : > { %v1250_v24 = vpop.eup %1249 }
 0x32c   : > { %v634_v23 = vpop.xlane.xlu2 %633  ;;  %v645_v26 = vmul.f32 %v1250_v24, %v1242_v8  ;;  %v1328_v8 = vmov 32.0   ;;  %v1182_v24 = vld [vmem:[%s1631_s9 + $0x30] sm:$0xff] }
 0x32d   : > { %1251 = vrcp.f32 %v634_v23  ;;  %979 = vmatpush.bf16.msra.mxu2 %v1182_v24 }
 0x32e   : > { %v649_v31 = vpack.c.bf16 %v645_v26, %v645_v26  ;;  %1253 = vrcp.f32 %v1328_v8  ;;  %v1181_v26 = vld [vmem:[%s1631_s9 + $0x28] sm:$0xff]  ;;  %v1235_v8 = vld [vmem:[%s1633_s11] ss:$0 sm:$0xff] }
 0x331   : > { %980 = vmatpush.bf16.msra.mxu2 %v1181_v26 }
 0x333   : > { %v1252_v25 = vpop.eup %1251 }
 0x334   : > { %v644_v27 = vmul.f32 %v1252_v25, %v1244_v10  ;;  %v715_v28 = vpop.permute.xlu2 %714  ;;  %v1254_v9 = vpop.eup %1253 }
 0x335   : > { %v720_v29 = vsel %vm655_vm2, %v715_v28, 0  ;;  %v836_v10 = vmul.f32 32.0, %v1254_v9  ;;  %vm840_vm3 = vweird.f32 %v1254_v9 }
 0x336   : > { %v648_v30 = vpack.c.bf16 %v644_v27, %v644_v27  ;;  %729 = vmatpush.bf16.msra.mxu0 %v720_v29  ;;  %v1180_v27 = vld [vmem:[%s1631_s9 + $0x20] sm:$0xff] }
 0x337   : > { %v837_v11 = vsub.f32 1.0, %v836_v10  ;;  %981 = vmatpush.bf16.msra.mxu2 %v1180_v27 }
 0x338   : > { %1121 = vmatmul.msk.bf16.vlgmr.msra.gmra.mxu3 %vm510_vm1, %v648_v30  ;;  %v1179_v30 = vld [vmem:[%s1631_s9 + $0x18] sm:$0xff] }
 0x339   : > { %1122 = vmatmul.msk.bf16.vlgmr.msra.gmra.mxu0 %vm510_vm1, %v649_v31  ;;  %v838_v12 = vmul.f32 %v1254_v9, %v837_v11  ;;  %v1236_v11 = vld [vmem:[%s1634_s12] ss:$0 sm:$0xff] }
 0x33a   : > { %813 = vmatpush.bf16.msrb.mxu0 %v804_v39 }
 0x33b   : > { %v839_v13 = vadd.f32 %v1254_v9, %v838_v12  ;;  %982 = vmatpush.bf16.msra.mxu2 %v1179_v30 }
 0x33d   : > { %v1531_v14 = vsel %vm840_vm3, %v1254_v9, %v839_v13 }
 0x33f   : > { %983 = vmatpush.bf16.msra.mxu2 %v1178_v33 }
 0x397   : > { %v668_v40 = vpop.f32.mrf.mxu1 }
 0x398   : > { %v735_v41 = vpack.c.bf16 %v668_v40, %v668_v40 }
 0x39a   : > { %1123 = vmatmul.msk.bf16.vlgmr.msra.gmra.mxu1 %vm510_vm1, %v735_v41 }
 0x39b   : > { %v689_v42 = vpop.f32.mrf.mxu2 }
 0x39c   : > { %v736_v43 = vpack.c.bf16 %v689_v42, %v689_v42 }
 0x39e   : > { %1124 = vmatmul.msk.bf16.vlgmr.msrb.gmra.mxu2 %vm510_vm1, %v736_v43  ;;  %v1177_v43 = vld [vmem:[%s1631_s9 + $0x8] sm:$0xff] }
 0x39f   : > { %v670_v44 = vpop.f32.mrf.mxu1  ;;  %984 = vmatpush.bf16.msra.mxu2 %v1177_v43 }
 0x3a0   : > { %v1176_v44 = vld [vmem:[%s1631_s9] sm:$0xff] }
 0x3a3   : > { %v691_v45 = vpop.f32.mrf.mxu2  ;;  %985 = vmatpush.bf16.msra.mxu2 %v1176_v44 }
 0x3a4   : > { %v1233_v45 = vld [vmem:[%s1630_s8] ss:$0 sm:$0xff] }
 0x3b6   : > { %v731_v46 = vpop.f32.mrf.mxu0 }
 0x3b7   : > { %v738_v47 = vpack.c.bf16 %v731_v46, %v731_v46 }
 0x3b9   : > { %1126 = vmatmul.msk.bf16.vlgmr.msrb.gmra.mxu0 %vm510_vm1, %v738_v47 }
 0x3bb   : > { %v710_v48 = vpop.f32.mrf.mxu3 }
 0x3bc   : > { %v737_v49 = vpack.c.bf16 %v710_v48, %v710_v48 }
 0x3be   : > { %v733_v50 = vpop.f32.mrf.mxu0  ;;  %1125 = vmatmul.msk.bf16.vlgmr.msrb.gmra.mxu3 %vm510_vm1, %v737_v49 }
 0x3c3   : > { %v712_v51 = vpop.f32.mrf.mxu3 }
 0x3c4   : > { %v1234_v51 = vld [vmem:[%s1632_s10] ss:$0 sm:$0xff] }
 0x417   : > { %v758_v52 = vpop.f32.mrf.mxu1 }
 0x418   : > { %v819_v59 = vsel %vm459_vm0, %v758_v52, 0.0 }
 0x41f   : > { %v760_v53 = vpop.f32.mrf.mxu1 }
 0x421   : > { %v777_v54 = vpop.f32.mrf.mxu2 }
 0x422   : > { %v820_v57 = vsel %vm459_vm0, %v777_v54, 0.0 }
 0x423   : > { %v821_v60 = vadd.f32 %v820_v57, %v819_v59 }
 0x429   : > { %v779_v55 = vpop.f32.mrf.mxu2 }
 0x436   : > { %v815_v56 = vpop.f32.mrf.mxu0 }
 0x437   : > { %v824_v1 = vsel %vm459_vm0, %v815_v56, 0.0 }
 0x43e   : > { %v817_v58 = vpop.f32.mrf.mxu0 }
 0x441   : > { %v796_v61 = vpop.f32.mrf.mxu3 }
 0x442   : > { %v822_v62 = vsel %vm459_vm0, %v796_v61, 0.0 }
 0x443   : > { %v823_v63 = vadd.f32 %v822_v62, %v821_v60 }
 0x445   : > { %v825_v3 = vadd.f32 %v824_v1, %v823_v63 }
 0x447   : > { %v830_v4 = vadd.f32 %v1230_v0, %v825_v3 }
 0x449   : > { %v798_v5 = vpop.f32.mrf.mxu3  ;;  %v831_v6 = vadd.f32 %v830_v4, %v1458_v2 }
 0x44b   : > { %v832_v7 = vsel %vm459_vm0, %v831_v6, 0.0 }
 0x44c   : > { %833 = vadd.xlane.f32.xlu1 %v832_v7 }
 0x4bf   : > { %v834_v15 = vpop.xlane.xlu1 %833 }
 0x4c0   : > { %v842_v16 = vmul.f32 %v1531_v14, %v834_v15 }
 0x4c2   : > { %v843_v17 = vsub.f32 %v831_v6, %v842_v16 }
 0x4c4   : > { %v844_v18 = vmul.f32 %v843_v17, %v843_v17 }
 0x4c6   : > { %v845_v2 = vsel %vm459_vm0, %v844_v18, 0.0 }
 0x4c7   : > { %846 = vadd.xlane.f32.xlu0 %v845_v2 }
 0x53a   : > { %v847_v22 = vpop.xlane.xlu0 %846 }
 0x53b   : > { %v848_v23 = vmul.f32 %v847_v22, %v1531_v14 }
 0x53d   : > { %v849_v25 = vadd.f32 1e-05, %v848_v23 }
 0x53f   : > { %1255 = vrsqrt.f32 %v849_v25  ;;  %vm856_vm5 = vweird.f32 %v849_v25 }
 0x545   : > { %v1256_v28 = vpop.eup %1255 }
 0x546   : > { %v851_v29 = vmul.f32 %v1256_v28, %v849_v25  ;;  %vm857_vm4 = vweird.f32 %v1256_v28 }
 0x547   : > { %vm858_vm6 = vmor %vm856_vm5, %vm857_vm4 }
 0x548   : > { %v852_v31 = vmul.f32 %v1256_v28, %v851_v29 }
 0x54a   : > { %v853_v32 = vmul.f32 0.5, %v852_v31 }
 0x54c   : > { %v854_v34 = vsub.f32 1.5, %v853_v32 }
 0x54e   : > { %v855_v35 = vmul.f32 %v1256_v28, %v854_v34 }
 0x550   : > { %v859_v37 = vsel %vm858_vm6, %v1256_v28, %v855_v35 }
 0x551   : > { %v860_v39 = vmul.f32 %v859_v37, %v843_v17 }
 0x553   : > { %v865_v40 = vmul.f32 %v1231_v36, %v860_v39 }
 0x555   : > { %v870_v41 = vadd.f32 %v1232_v38, %v865_v40 }
 0x557   : > { %v871_v42 = vpack.c.bf16 %v870_v41, %v870_v41 }
 0x559   : > { %1135 = vmatmul.msk.bf16.vlgmr.msrb.gmra.mxu1 %vm459_vm0, %v871_v42 }
 0x5d6   : > { %v904_v46 = vpop.f32.mrf.mxu1 }
 0x5d7   : > { %v905_v47 = vadd.f32 %v1233_v45, %v904_v46 }
 0x5d9   : > { %v908_v48 = vmax.f32 %v905_v47, 0.0 }
 0x5db   : > { %v909_v49 = vpack.c.bf16 %v908_v48, %v908_v48 }
 0x5dd   : > { %986 = vmatmul.bf16.vlgmr.msra.gmra.mxu2 %v909_v49 }
 0x5de   : > { %v906_v50 = vpop.f32.mrf.mxu1 }
 0x660   : > { %v987_v52 = vpop.f32.mrf.mxu2 }
 0x661   : > { %v988_v53 = vadd.f32 %v1234_v51, %v987_v52 }
 0x663   : > { %v991_v54 = vadd.f32 %v988_v53, %v870_v41 }
 0x665   : > { %v992_v55 = vsel %vm459_vm0, %v991_v54, 0.0 }
 0x666   : > { %993 = vadd.xlane.f32.xlu2 %v992_v55 }
 0x668   : > { %v989_v56 = vpop.f32.mrf.mxu2 }
 0x6d9   : > { %v994_v57 = vpop.xlane.xlu2 %993 }
 0x6da   : > { %v995_v58 = vmul.f32 %v994_v57, %v1531_v14 }
 0x6dc   : > { %v996_v59 = vsub.f32 %v991_v54, %v995_v58 }
 0x6de   : > { %v997_v60 = vmul.f32 %v996_v59, %v996_v59 }
 0x6e0   : > { %v998_v61 = vsel %vm459_vm0, %v997_v60, 0.0 }
 0x6e1   : > { %999 = vadd.xlane.f32.xlu1 %v998_v61 }
 0x754   : > { %v1000_v62 = vpop.xlane.xlu1 %999 }
 0x755   : > { %v1001_v63 = vmul.f32 %v1000_v62, %v1531_v14 }
 0x757   : > { %v1002_v0 = vadd.f32 1e-05, %v1001_v63 }
 0x759   : > { %1257 = vrsqrt.f32 %v1002_v0  ;;  %vm1009_vm8 = vweird.f32 %v1002_v0 }
 0x75f   : > { %v1258_v1 = vpop.eup %1257 }
 0x760   : > { %v1004_v3 = vmul.f32 %v1258_v1, %v1002_v0  ;;  %vm1010_vm7 = vweird.f32 %v1258_v1 }
 0x761   : > { %vm1011_vm9 = vmor %vm1009_vm8, %vm1010_vm7 }
 0x762   : > { %v1005_v4 = vmul.f32 %v1258_v1, %v1004_v3 }
 0x764   : > { %v1006_v5 = vmul.f32 0.5, %v1005_v4 }
 0x766   : > { %v1007_v6 = vsub.f32 1.5, %v1006_v5 }
 0x768   : > { %v1008_v7 = vmul.f32 %v1258_v1, %v1007_v6 }
 0x76a   : > { %v1012_v9 = vsel %vm1011_vm9, %v1258_v1, %v1008_v7 }
 0x76b   : > { %v1013_v10 = vmul.f32 %v1012_v9, %v996_v59 }
 0x76d   : > { %v1018_v12 = vmul.f32 %v1235_v8, %v1013_v10 }
 0x76f   : > { %v1023_v13 = vadd.f32 %v1236_v11, %v1018_v12 }
 0x771   : > { %1024 = vst.msk [vmem:[%s431_s1] sm:$0xff] %vm459_vm0, %v1023_v13 }
 0x772   : > { %1286 = shalt.err (!%p1283_p3)
}
 0x773   : > { %1184 = dma.vmem_to_hbm [thread:$0]  (%p1437_p5), %s1039_s29, 128, %s1041_s2, %s1026_s23  }
 0x774 PF: > { %p1190_p4 = scmp.ge.s32.totalorder %s1321_s28, 2  ;;  %s1052_s1 = sand.u32 1, %s1309_s25  }
 0x775   : > { %s1053_s20 = scalar_lea.sflag [#allocation3], %s1052_s1 }
 0x776   : > { %p1187_p7 = pnand %p1190_p4, %p1441_p6 }
 0x778   : > { %p1188_p8 = pneg %p1187_p7 }
 0x77a   : > { %1304 = dma.done.wait (%p1188_p8), %s1053_s20, 128  }
 0x77b   : > { %1306 = vsyncadd (%p1188_p8), %s1053_s20, 4294967168  ;;  %s1645_s16 = sld [smem:[#allocation5_spill]]  ;;  %p23_p9 = scmp.ge.s32.totalorder %s1424_s14, 4  }
 0x77c   : > { %s1646_s25 = smov %s1313_s26  ;;  %s1647_s26 = smov %s1317_s27 }
 0x77d   : > { %s1649_s28 = smov %s1424_s14  ;;  %25 = sbr.rel (!%p23_p9) target bundleno = 7 (0x7), region = 107 }
 0x781   : > { %s1648_s27 = smov %s1645_s16 }
 0x782   :  { %1059 = vsyncpa [#allocation3], 1 }
 0x783   :  { %1061 = vsyncpa [#allocation3 + $0x1], 1 }

</bundles_post_ra>
